<compile_context>
chip_gen: v6e
topology: v6e:2x2x1
jax: 0.10.0
libtpu: 0.0.40
codegen_flags: <defaults>
</compile_context>

<pallas_src>
import functools
import math

import jax
import jax.numpy as jnp
from jax.experimental import pallas as pl
from jax.experimental.pallas import tpu as pltpu

LN_EPS = 1e-5


def _transformer_block_kernel(
        xq_ref, xkv_ref,
        wq_ref, wk_ref, wv_ref, bq_ref, bk_ref, bv_ref,
        wo_ref, bo_ref,
        w1_ref, b1_ref, w2_ref, b2_ref,
        g1_ref, be1_ref, g2_ref, be2_ref,
        o_ref, *, num_heads):
    xq = xq_ref[0]                       # (tq, E) query / residual rows (native dtype)
    xkv = xkv_ref[0]                     # (S,  E) full sequence for K / V
    tq, E = xq.shape
    S = xkv.shape[0]
    H = num_heads
    d = E // H
    scale = 1.0 / math.sqrt(d)
    dt = xq.dtype                        # MXU operand dtype (bf16 stays bf16)

    # ---- QKV projections (weights already transposed: contraction dim leading) ----
    q = jnp.dot(xq, wq_ref[...], preferred_element_type=jnp.float32) \
        + bq_ref[...].astype(jnp.float32)                       # (tq, E) f32
    k = jnp.dot(xkv, wk_ref[...], preferred_element_type=jnp.float32) \
        + bk_ref[...].astype(jnp.float32)                       # (S, E)  f32
    v = jnp.dot(xkv, wv_ref[...], preferred_element_type=jnp.float32) \
        + bv_ref[...].astype(jnp.float32)                       # (S, E)  f32

    # ---- batched multi-head attention (heads = leading batch axis) ----------------
    qh = q.reshape(tq, H, d).transpose(1, 0, 2).astype(dt)      # (H, tq, d)
    kh = k.reshape(S, H, d).transpose(1, 0, 2).astype(dt)       # (H, S,  d)
    vh = v.reshape(S, H, d).transpose(1, 0, 2).astype(dt)       # (H, S,  d)

    s = jnp.einsum('hqd,hkd->hqk', qh, kh,
                   preferred_element_type=jnp.float32) * scale  # (H, tq, S) f32
    s = s - jnp.max(s, axis=-1, keepdims=True)
    p = jnp.exp(s)
    denom = jnp.sum(p, axis=-1, keepdims=True)
    p = p * pl.reciprocal(denom, approx=True)                   # EUP recip, not VALU div

    ctx = jnp.einsum('hqk,hkd->hqd', p.astype(dt), vh,
                     preferred_element_type=jnp.float32)        # (H, tq, d) f32
    attn = ctx.transpose(1, 0, 2).reshape(tq, E)                # (tq, E)

    attn = jnp.dot(attn.astype(dt), wo_ref[...],
                   preferred_element_type=jnp.float32) \
        + bo_ref[...].astype(jnp.float32)                       # out_proj

    # ---- residual + LayerNorm 1 (dropout = identity in eval) ----------------------
    h1 = xq.astype(jnp.float32) + attn
    mu1 = jnp.mean(h1, axis=-1, keepdims=True)
    var1 = jnp.mean(jnp.square(h1 - mu1), axis=-1, keepdims=True)
    y = (h1 - mu1) * jax.lax.rsqrt(var1 + LN_EPS)
    y = y * g1_ref[...].astype(jnp.float32) + be1_ref[...].astype(jnp.float32)

    # ---- feed-forward --------------------------------------------------------------
    ff = jnp.dot(y.astype(dt), w1_ref[...],
                 preferred_element_type=jnp.float32) + b1_ref[...].astype(jnp.float32)
    ff = jnp.maximum(ff, 0.0)                                   # ReLU
    ff = jnp.dot(ff.astype(dt), w2_ref[...],
                 preferred_element_type=jnp.float32) + b2_ref[...].astype(jnp.float32)

    # ---- residual + LayerNorm 2 ----------------------------------------------------
    h2 = y + ff
    mu2 = jnp.mean(h2, axis=-1, keepdims=True)
    var2 = jnp.mean(jnp.square(h2 - mu2), axis=-1, keepdims=True)
    z = (h2 - mu2) * jax.lax.rsqrt(var2 + LN_EPS)
    z = z * g2_ref[...].astype(jnp.float32) + be2_ref[...].astype(jnp.float32)

    o_ref[0] = z.astype(o_ref.dtype)


def _choose_seq_tile(S):
    """Largest convenient query tile: full S if small, else a multiple of 8 dividing S."""
    if S <= 256:
        return S
    for t in (512, 256, 128, 64, 32, 16, 8):
        if S % t == 0:
            return t
    return S


def transformer_block(x, wqkv, bqkv, wo, bo, w1, b1, w2, b2,
                      g1, be1, g2, be2, *, num_heads):
    B, S, E = x.shape
    tq = _choose_seq_tile(S)
    n_q = S // tq

    # Host-side (one-time) weight prep: split packed QKV and pre-transpose everything
    # so the contraction dimension is leading -> no in-kernel transposes.
    wq_t = jnp.transpose(wqkv[:E])           # (E, E)
    wk_t = jnp.transpose(wqkv[E:2 * E])      # (E, E)
    wv_t = jnp.transpose(wqkv[2 * E:])       # (E, E)
    bq = bqkv[:, :E]
    bk = bqkv[:, E:2 * E]
    bv = bqkv[:, 2 * E:]
    wo_t = jnp.transpose(wo)                 # (E, E)
    w1_t = jnp.transpose(w1)                 # (E, F)
    w2_t = jnp.transpose(w2)                 # (F, E)

    def replicated(arr):
        # full-array block, same tile at every grid step
        nd = arr.ndim
        return pl.BlockSpec(arr.shape, lambda b, i, _nd=nd: (0,) * _nd)

    kernel = functools.partial(_transformer_block_kernel, num_heads=num_heads)

    return pl.pallas_call(
        kernel,
        out_shape=jax.ShapeDtypeStruct((B, S, E), x.dtype),
        grid_spec=pltpu.PrefetchScalarGridSpec(
            num_scalar_prefetch=0,
            grid=(B, n_q),
            in_specs=[
                pl.BlockSpec((1, tq, E), lambda b, i: (b, i, 0)),   # query / residual rows
                pl.BlockSpec((1, S, E), lambda b, i: (b, 0, 0)),    # full sequence for K/V
                replicated(wq_t), replicated(wk_t), replicated(wv_t),
                replicated(bq), replicated(bk), replicated(bv),
                replicated(wo_t), replicated(bo),
                replicated(w1_t), replicated(b1),
                replicated(w2_t), replicated(b2),
                replicated(g1), replicated(be1),
                replicated(g2), replicated(be2),
            ],
            out_specs=pl.BlockSpec((1, tq, E), lambda b, i: (b, i, 0)),
        ),
        compiler_params=pltpu.CompilerParams(
            dimension_semantics=("parallel", "parallel"),
            vmem_limit_bytes=64 * 1024 * 1024,
        ),
    )(x, x, wq_t, wk_t, wv_t, bq, bk, bv, wo_t, bo,
      w1_t, b1, w2_t, b2, g1, be1, g2, be2)


def _reference(x, wqkv, bqkv, wo, bo, w1, b1, w2, b2, g1, be1, g2, be2, num_heads):
    """Pure-JAX reference mirroring PyTorch nn.MultiheadAttention + FFN + LayerNorms."""
    B, S, E = x.shape
    d = E // num_heads
    qkv = jnp.einsum('bse,fe->bsf', x, wqkv) + bqkv[0]
    q, k, v = qkv[..., :E], qkv[..., E:2 * E], qkv[..., 2 * E:]
    q = q.reshape(B, S, num_heads, d).transpose(0, 2, 1, 3)
    k = k.reshape(B, S, num_heads, d).transpose(0, 2, 1, 3)
    v = v.reshape(B, S, num_heads, d).transpose(0, 2, 1, 3)
    s = jnp.einsum('bhqd,bhkd->bhqk', q, k) / jnp.sqrt(jnp.float32(d))
    p = jax.nn.softmax(s, axis=-1)
    ctx = jnp.einsum('bhqk,bhkd->bhqd', p, v).transpose(0, 2, 1, 3).reshape(B, S, E)
    attn = jnp.einsum('bse,fe->bsf', ctx, wo) + bo[0]

    def ln(h, g, be):
        mu = jnp.mean(h, axis=-1, keepdims=True)
        var = jnp.mean((h - mu) ** 2, axis=-1, keepdims=True)
        return (h - mu) / jnp.sqrt(var + LN_EPS) * g[0] + be[0]

    y = ln(x + attn, g1, be1)
    ff = jnp.maximum(jnp.einsum('bse,fe->bsf', y, w1) + b1[0], 0.0)
    ff = jnp.einsum('bsf,ef->bse', ff, w2) + b2[0]
    return ln(y + ff, g2, be2)


if __name__ == "__main__":
    # small shapes consistent with the module: batch=2, seq=8, embed=32, heads=4, ff_hidden=64
    B, S, E, H, F = 2, 8, 32, 4, 64
    key = jax.random.PRNGKey(0)
    keys = jax.random.split(key, 9)
    sc = 0.05

    x = jax.random.normal(keys[0], (B, S, E), dtype=jnp.float32)

    # deterministic synthetic parameters (PyTorch layouts: in_proj_weight, Linear.weight, ...)
    wqkv = jax.random.normal(keys[1], (3 * E, E), dtype=jnp.float32) * sc
    bqkv = jax.random.normal(keys[2], (1, 3 * E), dtype=jnp.float32) * sc
    wo = jax.random.normal(keys[3], (E, E), dtype=jnp.float32) * sc
    bo = jax.random.normal(keys[4], (1, E), dtype=jnp.float32) * sc
    w1 = jax.random.normal(keys[5], (F, E), dtype=jnp.float32) * sc
    b1 = jax.random.normal(keys[6], (1, F), dtype=jnp.float32) * sc
    w2 = jax.random.normal(keys[7], (E, F), dtype=jnp.float32) * sc
    b2 = jax.random.normal(keys[8], (1, E), dtype=jnp.float32) * sc
    g1 = jnp.ones((1, E), jnp.float32)
    be1 = jnp.zeros((1, E), jnp.float32)
    g2 = jnp.ones((1, E), jnp.float32)
    be2 = jnp.zeros((1, E), jnp.float32)

    out = transformer_block(x, wqkv, bqkv, wo, bo, w1, b1, w2, b2,
                            g1, be1, g2, be2, num_heads=H)
    jax.block_until_ready(out)
    assert out.shape == (B, S, E)

    ref = _reference(x, wqkv, bqkv, wo, bo, w1, b1, w2, b2,
                     g1, be1, g2, be2, num_heads=H)
    max_err = float(jnp.max(jnp.abs(out - ref)))
    # generous tolerance: approx reciprocal in softmax adds ~1e-4 relative error
    assert max_err < 1e-2, f"mismatch vs reference: {max_err}"
    print("KERNEL_OK")
</pallas_src>

<mosaic_0001>
module attributes {stable_mosaic.version = 11 : i64} {
  func.func @_transformer_block_kernel(%arg0: i32, %arg1: i32, %arg2: memref<1x8x32xf32, #tpu.memory_space<vmem>>, %arg3: memref<1x8x32xf32, #tpu.memory_space<vmem>>, %arg4: memref<32x32xf32, #tpu.memory_space<vmem>>, %arg5: memref<32x32xf32, #tpu.memory_space<vmem>>, %arg6: memref<32x32xf32, #tpu.memory_space<vmem>>, %arg7: memref<1x32xf32, #tpu.memory_space<vmem>>, %arg8: memref<1x32xf32, #tpu.memory_space<vmem>>, %arg9: memref<1x32xf32, #tpu.memory_space<vmem>>, %arg10: memref<32x32xf32, #tpu.memory_space<vmem>>, %arg11: memref<1x32xf32, #tpu.memory_space<vmem>>, %arg12: memref<32x64xf32, #tpu.memory_space<vmem>>, %arg13: memref<1x64xf32, #tpu.memory_space<vmem>>, %arg14: memref<64x32xf32, #tpu.memory_space<vmem>>, %arg15: memref<1x32xf32, #tpu.memory_space<vmem>>, %arg16: memref<1x32xf32, #tpu.memory_space<vmem>>, %arg17: memref<1x32xf32, #tpu.memory_space<vmem>>, %arg18: memref<1x32xf32, #tpu.memory_space<vmem>>, %arg19: memref<1x32xf32, #tpu.memory_space<vmem>>, %arg20: memref<1x8x32xf32, #tpu.memory_space<vmem>>) attributes {dimension_semantics = [#tpu.dimension_semantics<parallel>, #tpu.dimension_semantics<parallel>], iteration_bounds = array<i64: 2, 1>, scalar_prefetch = 0 : i64, scratch_operands = 0 : i64, tpu.core_type = #tpu.core_type<tc>, window_params = [{transform_indices = @transform_0, window_bounds = array<i64: 1, 8, 32>}, {transform_indices = @transform_1, window_bounds = array<i64: 1, 8, 32>}, {pipeline_mode = #tpu.pipeline_mode<synchronous>, transform_indices = @transform_2, window_bounds = array<i64: 32, 32>}, {pipeline_mode = #tpu.pipeline_mode<synchronous>, transform_indices = @transform_3, window_bounds = array<i64: 32, 32>}, {pipeline_mode = #tpu.pipeline_mode<synchronous>, transform_indices = @transform_4, window_bounds = array<i64: 32, 32>}, {pipeline_mode = #tpu.pipeline_mode<synchronous>, transform_indices = @transform_5, window_bounds = array<i64: 1, 32>}, {pipeline_mode = #tpu.pipeline_mode<synchronous>, transform_indices = @transform_6, window_bounds = array<i64: 1, 32>}, {pipeline_mode = #tpu.pipeline_mode<synchronous>, transform_indices = @transform_7, window_bounds = array<i64: 1, 32>}, {pipeline_mode = #tpu.pipeline_mode<synchronous>, transform_indices = @transform_8, window_bounds = array<i64: 32, 32>}, {pipeline_mode = #tpu.pipeline_mode<synchronous>, transform_indices = @transform_9, window_bounds = array<i64: 1, 32>}, {pipeline_mode = #tpu.pipeline_mode<synchronous>, transform_indices = @transform_10, window_bounds = array<i64: 32, 64>}, {pipeline_mode = #tpu.pipeline_mode<synchronous>, transform_indices = @transform_11, window_bounds = array<i64: 1, 64>}, {pipeline_mode = #tpu.pipeline_mode<synchronous>, transform_indices = @transform_12, window_bounds = array<i64: 64, 32>}, {pipeline_mode = #tpu.pipeline_mode<synchronous>, transform_indices = @transform_13, window_bounds = array<i64: 1, 32>}, {pipeline_mode = #tpu.pipeline_mode<synchronous>, transform_indices = @transform_14, window_bounds = array<i64: 1, 32>}, {pipeline_mode = #tpu.pipeline_mode<synchronous>, transform_indices = @transform_15, window_bounds = array<i64: 1, 32>}, {pipeline_mode = #tpu.pipeline_mode<synchronous>, transform_indices = @transform_16, window_bounds = array<i64: 1, 32>}, {pipeline_mode = #tpu.pipeline_mode<synchronous>, transform_indices = @transform_17, window_bounds = array<i64: 1, 32>}, {transform_indices = @transform_18, window_bounds = array<i64: 1, 8, 32>}]} {
    %c0 = arith.constant 0 : index
    %c0_0 = arith.constant 0 : index
    %c0_1 = arith.constant 0 : index
    %0 = vector.load %arg2[%c0, %c0_0, %c0_1] : memref<1x8x32xf32, #tpu.memory_space<vmem>>, vector<1x8x32xf32>
    %1 = vector.shape_cast %0 : vector<1x8x32xf32> to vector<8x32xf32>
    %c0_2 = arith.constant 0 : index
    %c0_3 = arith.constant 0 : index
    %c0_4 = arith.constant 0 : index
    %2 = vector.load %arg3[%c0_2, %c0_3, %c0_4] : memref<1x8x32xf32, #tpu.memory_space<vmem>>, vector<1x8x32xf32>
    %3 = vector.shape_cast %2 : vector<1x8x32xf32> to vector<8x32xf32>
    %c0_5 = arith.constant 0 : index
    %c0_6 = arith.constant 0 : index
    %4 = vector.load %arg4[%c0_5, %c0_6] : memref<32x32xf32, #tpu.memory_space<vmem>>, vector<32x32xf32>
    %cst = arith.constant dense<0.000000e+00> : vector<8x32xf32>
    %5 = tpu.matmul %1, %4, %cst {dimension_numbers = #tpu.dot_dimension_numbers<[1], [0], [0], [1], [0, 0, 1, 1], [], []>} : vector<8x32xf32>, vector<32x32xf32>, vector<8x32xf32> -> vector<8x32xf32>
    %c0_7 = arith.constant 0 : index
    %c0_8 = arith.constant 0 : index
    %6 = vector.load %arg7[%c0_7, %c0_8] : memref<1x32xf32, #tpu.memory_space<vmem>>, vector<1x32xf32>
    %7 = vector.broadcast %6 : vector<1x32xf32> to vector<8x32xf32>
    %8 = arith.addf %5, %7 : vector<8x32xf32>
    %c0_9 = arith.constant 0 : index
    %c0_10 = arith.constant 0 : index
    %9 = vector.load %arg5[%c0_9, %c0_10] : memref<32x32xf32, #tpu.memory_space<vmem>>, vector<32x32xf32>
    %cst_11 = arith.constant dense<0.000000e+00> : vector<8x32xf32>
    %10 = tpu.matmul %3, %9, %cst_11 {dimension_numbers = #tpu.dot_dimension_numbers<[1], [0], [0], [1], [0, 0, 1, 1], [], []>} : vector<8x32xf32>, vector<32x32xf32>, vector<8x32xf32> -> vector<8x32xf32>
    %c0_12 = arith.constant 0 : index
    %c0_13 = arith.constant 0 : index
    %11 = vector.load %arg8[%c0_12, %c0_13] : memref<1x32xf32, #tpu.memory_space<vmem>>, vector<1x32xf32>
    %12 = vector.broadcast %11 : vector<1x32xf32> to vector<8x32xf32>
    %13 = arith.addf %10, %12 : vector<8x32xf32>
    %c0_14 = arith.constant 0 : index
    %c0_15 = arith.constant 0 : index
    %14 = vector.load %arg6[%c0_14, %c0_15] : memref<32x32xf32, #tpu.memory_space<vmem>>, vector<32x32xf32>
    %cst_16 = arith.constant dense<0.000000e+00> : vector<8x32xf32>
    %15 = tpu.matmul %3, %14, %cst_16 {dimension_numbers = #tpu.dot_dimension_numbers<[1], [0], [0], [1], [0, 0, 1, 1], [], []>} : vector<8x32xf32>, vector<32x32xf32>, vector<8x32xf32> -> vector<8x32xf32>
    %c0_17 = arith.constant 0 : index
    %c0_18 = arith.constant 0 : index
    %16 = vector.load %arg9[%c0_17, %c0_18] : memref<1x32xf32, #tpu.memory_space<vmem>>, vector<1x32xf32>
    %17 = vector.broadcast %16 : vector<1x32xf32> to vector<8x32xf32>
    %18 = arith.addf %15, %17 : vector<8x32xf32>
    %19 = vector.shape_cast %8 : vector<8x32xf32> to vector<8x4x8xf32>
    %20 = tpu.transpose %19, [1, 0, 2] : vector<8x4x8xf32> -> vector<4x8x8xf32>
    %21 = vector.shape_cast %13 : vector<8x32xf32> to vector<8x4x8xf32>
    %22 = tpu.transpose %21, [1, 0, 2] : vector<8x4x8xf32> -> vector<4x8x8xf32>
    %23 = vector.shape_cast %18 : vector<8x32xf32> to vector<8x4x8xf32>
    %24 = tpu.transpose %23, [1, 0, 2] : vector<8x4x8xf32> -> vector<4x8x8xf32>
    "tpu.trace_start"() <{level = 10 : i32, message = "hqd,hkd->hqk"}> : () -> ()
    %cst_19 = arith.constant dense<0.000000e+00> : vector<4x8x8xf32>
    %25 = tpu.matmul %20, %22, %cst_19 {dimension_numbers = #tpu.dot_dimension_numbers<[2], [2], [1], [1], [0, 0, 0, 1, 1, 1], [0], [0]>} : vector<4x8x8xf32>, vector<4x8x8xf32>, vector<4x8x8xf32> -> vector<4x8x8xf32>
    "tpu.trace_stop"() : () -> ()
    %cst_20 = arith.constant 0.353553385 : f32
    %26 = vector.broadcast %cst_20 : f32 to vector<4x8x8xf32>
    %27 = arith.mulf %25, %26 : vector<4x8x8xf32>
    %cst_21 = arith.constant dense<0xFF800000> : vector<4x8xf32>
    %28 = vector.multi_reduction <maximumf>, %27, %cst_21 [2] : vector<4x8x8xf32> to vector<4x8xf32>
    %29 = vector.shape_cast %28 : vector<4x8xf32> to vector<4x8x1xf32>
    %30 = vector.broadcast %29 : vector<4x8x1xf32> to vector<4x8x8xf32>
    %31 = arith.subf %27, %30 : vector<4x8x8xf32>
    %32 = math.exp %31 : vector<4x8x8xf32>
    %cst_22 = arith.constant dense<0.000000e+00> : vector<4x8xf32>
    %33 = vector.multi_reduction <add>, %32, %cst_22 [2] : vector<4x8x8xf32> to vector<4x8xf32>
    %34 = vector.shape_cast %33 : vector<4x8xf32> to vector<4x8x1xf32>
    %35 = tpu.reciprocal %34 {approx = true} : vector<4x8x1xf32> -> vector<4x8x1xf32>
    %36 = vector.broadcast %35 : vector<4x8x1xf32> to vector<4x8x8xf32>
    %37 = arith.mulf %32, %36 : vector<4x8x8xf32>
    "tpu.trace_start"() <{level = 10 : i32, message = "hqk,hkd->hqd"}> : () -> ()
    %cst_23 = arith.constant dense<0.000000e+00> : vector<4x8x8xf32>
    %38 = tpu.matmul %37, %24, %cst_23 {dimension_numbers = #tpu.dot_dimension_numbers<[2], [1], [1], [2], [0, 0, 0, 1, 1, 2], [0], [0]>} : vector<4x8x8xf32>, vector<4x8x8xf32>, vector<4x8x8xf32> -> vector<4x8x8xf32>
    "tpu.trace_stop"() : () -> ()
    %39 = tpu.transpose %38, [1, 0, 2] : vector<4x8x8xf32> -> vector<8x4x8xf32>
    %40 = vector.shape_cast %39 : vector<8x4x8xf32> to vector<8x32xf32>
    %c0_24 = arith.constant 0 : index
    %c0_25 = arith.constant 0 : index
    %41 = vector.load %arg10[%c0_24, %c0_25] : memref<32x32xf32, #tpu.memory_space<vmem>>, vector<32x32xf32>
    %cst_26 = arith.constant dense<0.000000e+00> : vector<8x32xf32>
    %42 = tpu.matmul %40, %41, %cst_26 {dimension_numbers = #tpu.dot_dimension_numbers<[1], [0], [0], [1], [0, 0, 1, 1], [], []>} : vector<8x32xf32>, vector<32x32xf32>, vector<8x32xf32> -> vector<8x32xf32>
    %c0_27 = arith.constant 0 : index
    %c0_28 = arith.constant 0 : index
    %43 = vector.load %arg11[%c0_27, %c0_28] : memref<1x32xf32, #tpu.memory_space<vmem>>, vector<1x32xf32>
    %44 = vector.broadcast %43 : vector<1x32xf32> to vector<8x32xf32>
    %45 = arith.addf %42, %44 : vector<8x32xf32>
    %46 = arith.addf %1, %45 : vector<8x32xf32>
    %cst_29 = arith.constant dense<0.000000e+00> : vector<8xf32>
    %47 = vector.multi_reduction <add>, %46, %cst_29 [1] : vector<8x32xf32> to vector<8xf32>
    %48 = vector.shape_cast %47 : vector<8xf32> to vector<8x1xf32>
    %cst_30 = arith.constant 3.200000e+01 : f32
    %49 = vector.broadcast %cst_30 : f32 to vector<8x1xf32>
    %50 = arith.divf %48, %49 : vector<8x1xf32>
    %51 = vector.broadcast %50 : vector<8x1xf32> to vector<8x32xf32>
    %52 = arith.subf %46, %51 : vector<8x32xf32>
    %53 = arith.mulf %52, %52 : vector<8x32xf32>
    %cst_31 = arith.constant dense<0.000000e+00> : vector<8xf32>
    %54 = vector.multi_reduction <add>, %53, %cst_31 [1] : vector<8x32xf32> to vector<8xf32>
    %55 = vector.shape_cast %54 : vector<8xf32> to vector<8x1xf32>
    %cst_32 = arith.constant 3.200000e+01 : f32
    %56 = vector.broadcast %cst_32 : f32 to vector<8x1xf32>
    %57 = arith.divf %55, %56 : vector<8x1xf32>
    %58 = vector.broadcast %50 : vector<8x1xf32> to vector<8x32xf32>
    %59 = arith.subf %46, %58 : vector<8x32xf32>
    %cst_33 = arith.constant 9.99999974E-6 : f32
    %60 = vector.broadcast %cst_33 : f32 to vector<8x1xf32>
    %61 = arith.addf %57, %60 : vector<8x1xf32>
    %62 = math.rsqrt %61 : vector<8x1xf32>
    %63 = vector.broadcast %62 : vector<8x1xf32> to vector<8x32xf32>
    %64 = arith.mulf %59, %63 : vector<8x32xf32>
    %c0_34 = arith.constant 0 : index
    %c0_35 = arith.constant 0 : index
    %65 = vector.load %arg16[%c0_34, %c0_35] : memref<1x32xf32, #tpu.memory_space<vmem>>, vector<1x32xf32>
    %66 = vector.broadcast %65 : vector<1x32xf32> to vector<8x32xf32>
    %67 = arith.mulf %64, %66 : vector<8x32xf32>
    %c0_36 = arith.constant 0 : index
    %c0_37 = arith.constant 0 : index
    %68 = vector.load %arg17[%c0_36, %c0_37] : memref<1x32xf32, #tpu.memory_space<vmem>>, vector<1x32xf32>
    %69 = vector.broadcast %68 : vector<1x32xf32> to vector<8x32xf32>
    %70 = arith.addf %67, %69 : vector<8x32xf32>
    %c0_38 = arith.constant 0 : index
    %c0_39 = arith.constant 0 : index
    %71 = vector.load %arg12[%c0_38, %c0_39] : memref<32x64xf32, #tpu.memory_space<vmem>>, vector<32x64xf32>
    %cst_40 = arith.constant dense<0.000000e+00> : vector<8x64xf32>
    %72 = tpu.matmul %70, %71, %cst_40 {dimension_numbers = #tpu.dot_dimension_numbers<[1], [0], [0], [1], [0, 0, 1, 1], [], []>} : vector<8x32xf32>, vector<32x64xf32>, vector<8x64xf32> -> vector<8x64xf32>
    %c0_41 = arith.constant 0 : index
    %c0_42 = arith.constant 0 : index
    %73 = vector.load %arg13[%c0_41, %c0_42] : memref<1x64xf32, #tpu.memory_space<vmem>>, vector<1x64xf32>
    %74 = vector.broadcast %73 : vector<1x64xf32> to vector<8x64xf32>
    %75 = arith.addf %72, %74 : vector<8x64xf32>
    %cst_43 = arith.constant 0.000000e+00 : f32
    %76 = vector.broadcast %cst_43 : f32 to vector<8x64xf32>
    %77 = arith.maximumf %75, %76 : vector<8x64xf32>
    %c0_44 = arith.constant 0 : index
    %c0_45 = arith.constant 0 : index
    %78 = vector.load %arg14[%c0_44, %c0_45] : memref<64x32xf32, #tpu.memory_space<vmem>>, vector<64x32xf32>
    %cst_46 = arith.constant dense<0.000000e+00> : vector<8x32xf32>
    %79 = tpu.matmul %77, %78, %cst_46 {dimension_numbers = #tpu.dot_dimension_numbers<[1], [0], [0], [1], [0, 0, 1, 1], [], []>} : vector<8x64xf32>, vector<64x32xf32>, vector<8x32xf32> -> vector<8x32xf32>
    %c0_47 = arith.constant 0 : index
    %c0_48 = arith.constant 0 : index
    %80 = vector.load %arg15[%c0_47, %c0_48] : memref<1x32xf32, #tpu.memory_space<vmem>>, vector<1x32xf32>
    %81 = vector.broadcast %80 : vector<1x32xf32> to vector<8x32xf32>
    %82 = arith.addf %79, %81 : vector<8x32xf32>
    %83 = arith.addf %70, %82 : vector<8x32xf32>
    %cst_49 = arith.constant dense<0.000000e+00> : vector<8xf32>
    %84 = vector.multi_reduction <add>, %83, %cst_49 [1] : vector<8x32xf32> to vector<8xf32>
    %85 = vector.shape_cast %84 : vector<8xf32> to vector<8x1xf32>
    %cst_50 = arith.constant 3.200000e+01 : f32
    %86 = vector.broadcast %cst_50 : f32 to vector<8x1xf32>
    %87 = arith.divf %85, %86 : vector<8x1xf32>
    %88 = vector.broadcast %87 : vector<8x1xf32> to vector<8x32xf32>
    %89 = arith.subf %83, %88 : vector<8x32xf32>
    %90 = arith.mulf %89, %89 : vector<8x32xf32>
    %cst_51 = arith.constant dense<0.000000e+00> : vector<8xf32>
    %91 = vector.multi_reduction <add>, %90, %cst_51 [1] : vector<8x32xf32> to vector<8xf32>
    %92 = vector.shape_cast %91 : vector<8xf32> to vector<8x1xf32>
    %cst_52 = arith.constant 3.200000e+01 : f32
    %93 = vector.broadcast %cst_52 : f32 to vector<8x1xf32>
    %94 = arith.divf %92, %93 : vector<8x1xf32>
    %95 = vector.broadcast %87 : vector<8x1xf32> to vector<8x32xf32>
    %96 = arith.subf %83, %95 : vector<8x32xf32>
    %cst_53 = arith.constant 9.99999974E-6 : f32
    %97 = vector.broadcast %cst_53 : f32 to vector<8x1xf32>
    %98 = arith.addf %94, %97 : vector<8x1xf32>
    %99 = math.rsqrt %98 : vector<8x1xf32>
    %100 = vector.broadcast %99 : vector<8x1xf32> to vector<8x32xf32>
    %101 = arith.mulf %96, %100 : vector<8x32xf32>
    %c0_54 = arith.constant 0 : index
    %c0_55 = arith.constant 0 : index
    %102 = vector.load %arg18[%c0_54, %c0_55] : memref<1x32xf32, #tpu.memory_space<vmem>>, vector<1x32xf32>
    %103 = vector.broadcast %102 : vector<1x32xf32> to vector<8x32xf32>
    %104 = arith.mulf %101, %103 : vector<8x32xf32>
    %c0_56 = arith.constant 0 : index
    %c0_57 = arith.constant 0 : index
    %105 = vector.load %arg19[%c0_56, %c0_57] : memref<1x32xf32, #tpu.memory_space<vmem>>, vector<1x32xf32>
    %106 = vector.broadcast %105 : vector<1x32xf32> to vector<8x32xf32>
    %107 = arith.addf %104, %106 : vector<8x32xf32>
    %c0_58 = arith.constant 0 : index
    %c0_59 = arith.constant 0 : index
    %c0_60 = arith.constant 0 : index
    %108 = vector.load %arg20[%c0_58, %c0_59, %c0_60] : memref<1x8x32xf32, #tpu.memory_space<vmem>>, vector<1x8x32xf32>
    %109 = vector.shape_cast %108 : vector<1x8x32xf32> to vector<8x32xf32>
    %110 = vector.shape_cast %107 : vector<8x32xf32> to vector<1x8x32xf32>
    tpu.vector_store %arg20[%c0_58, %c0_59, %c0_60], %110 {strides = array<i32>} : memref<1x8x32xf32, #tpu.memory_space<vmem>>, vector<1x8x32xf32>,
    return
  }
  func.func @transform_0(%arg0: i32, %arg1: i32) -> (i32, i32, i32) {
    %c0_i32 = arith.constant 0 : i32
    %c0_i32_0 = arith.constant 0 : i32
    return %arg0, %arg1, %c0_i32 : i32, i32, i32
  }
  func.func @transform_1(%arg0: i32, %arg1: i32) -> (i32, i32, i32) {
    %c0_i32 = arith.constant 0 : i32
    %c0_i32_0 = arith.constant 0 : i32
    %c0_i32_1 = arith.constant 0 : i32
    return %arg0, %c0_i32, %c0_i32_0 : i32, i32, i32
  }
  func.func @transform_2(%arg0: i32, %arg1: i32) -> (i32, i32) {
    %c0_i32 = arith.constant 0 : i32
    %c0_i32_0 = arith.constant 0 : i32
    %c0_i32_1 = arith.constant 0 : i32
    return %c0_i32, %c0_i32_0 : i32, i32
  }
  func.func @transform_3(%arg0: i32, %arg1: i32) -> (i32, i32) {
    %c0_i32 = arith.constant 0 : i32
    %c0_i32_0 = arith.constant 0 : i32
    %c0_i32_1 = arith.constant 0 : i32
    return %c0_i32, %c0_i32_0 : i32, i32
  }
  func.func @transform_4(%arg0: i32, %arg1: i32) -> (i32, i32) {
    %c0_i32 = arith.constant 0 : i32
    %c0_i32_0 = arith.constant 0 : i32
    %c0_i32_1 = arith.constant 0 : i32
    return %c0_i32, %c0_i32_0 : i32, i32
  }
  func.func @transform_5(%arg0: i32, %arg1: i32) -> (i32, i32) {
    %c0_i32 = arith.constant 0 : i32
    %c0_i32_0 = arith.constant 0 : i32
    %c0_i32_1 = arith.constant 0 : i32
    return %c0_i32, %c0_i32_0 : i32, i32
  }
  func.func @transform_6(%arg0: i32, %arg1: i32) -> (i32, i32) {
    %c0_i32 = arith.constant 0 : i32
    %c0_i32_0 = arith.constant 0 : i32
    %c0_i32_1 = arith.constant 0 : i32
    return %c0_i32, %c0_i32_0 : i32, i32
  }
  func.func @transform_7(%arg0: i32, %arg1: i32) -> (i32, i32) {
    %c0_i32 = arith.constant 0 : i32
    %c0_i32_0 = arith.constant 0 : i32
    %c0_i32_1 = arith.constant 0 : i32
    return %c0_i32, %c0_i32_0 : i32, i32
  }
  func.func @transform_8(%arg0: i32, %arg1: i32) -> (i32, i32) {
    %c0_i32 = arith.constant 0 : i32
    %c0_i32_0 = arith.constant 0 : i32
    %c0_i32_1 = arith.constant 0 : i32
    return %c0_i32, %c0_i32_0 : i32, i32
  }
  func.func @transform_9(%arg0: i32, %arg1: i32) -> (i32, i32) {
    %c0_i32 = arith.constant 0 : i32
    %c0_i32_0 = arith.constant 0 : i32
    %c0_i32_1 = arith.constant 0 : i32
    return %c0_i32, %c0_i32_0 : i32, i32
  }
  func.func @transform_10(%arg0: i32, %arg1: i32) -> (i32, i32) {
    %c0_i32 = arith.constant 0 : i32
    %c0_i32_0 = arith.constant 0 : i32
    %c0_i32_1 = arith.constant 0 : i32
    return %c0_i32, %c0_i32_0 : i32, i32
  }
  func.func @transform_11(%arg0: i32, %arg1: i32) -> (i32, i32) {
    %c0_i32 = arith.constant 0 : i32
    %c0_i32_0 = arith.constant 0 : i32
    %c0_i32_1 = arith.constant 0 : i32
    return %c0_i32, %c0_i32_0 : i32, i32
  }
  func.func @transform_12(%arg0: i32, %arg1: i32) -> (i32, i32) {
    %c0_i32 = arith.constant 0 : i32
    %c0_i32_0 = arith.constant 0 : i32
    %c0_i32_1 = arith.constant 0 : i32
    return %c0_i32, %c0_i32_0 : i32, i32
  }
  func.func @transform_13(%arg0: i32, %arg1: i32) -> (i32, i32) {
    %c0_i32 = arith.constant 0 : i32
    %c0_i32_0 = arith.constant 0 : i32
    %c0_i32_1 = arith.constant 0 : i32
    return %c0_i32, %c0_i32_0 : i32, i32
  }
  func.func @transform_14(%arg0: i32, %arg1: i32) -> (i32, i32) {
    %c0_i32 = arith.constant 0 : i32
    %c0_i32_0 = arith.constant 0 : i32
    %c0_i32_1 = arith.constant 0 : i32
    return %c0_i32, %c0_i32_0 : i32, i32
  }
  func.func @transform_15(%arg0: i32, %arg1: i32) -> (i32, i32) {
    %c0_i32 = arith.constant 0 : i32
    %c0_i32_0 = arith.constant 0 : i32
    %c0_i32_1 = arith.constant 0 : i32
    return %c0_i32, %c0_i32_0 : i32, i32
  }
  func.func @transform_16(%arg0: i32, %arg1: i32) -> (i32, i32) {
    %c0_i32 = arith.constant 0 : i32
    %c0_i32_0 = arith.constant 0 : i32
    %c0_i32_1 = arith.constant 0 : i32
    return %c0_i32, %c0_i32_0 : i32, i32
  }
  func.func @transform_17(%arg0: i32, %arg1: i32) -> (i32, i32) {
    %c0_i32 = arith.constant 0 : i32
    %c0_i32_0 = arith.constant 0 : i32
    %c0_i32_1 = arith.constant 0 : i32
    return %c0_i32, %c0_i32_0 : i32, i32
  }
  func.func @transform_18(%arg0: i32, %arg1: i32) -> (i32, i32, i32) {
    %c0_i32 = arith.constant 0 : i32
    %c0_i32_0 = arith.constant 0 : i32
    return %arg0, %arg1, %c0_i32 : i32, i32, i32
  }
}

</mosaic_0001>

<bundles_post_ra>
// kernel: tpu_custom_call.1
= control target key start
LH: loop header
LB: loop body
LE: loop exit
PB: predicated region body
PF: predicated region fallthrough
CT: control target
= control target key end

     0   :  { %s3755_s0 = inlined_call_operand.hbm [shape: f32[2,8,32], index: 0, kind: input, shape index: {}]   ;;  %s3756_s1 = inlined_call_operand.hbm [shape: f32[2,8,32], index: 1, kind: input, shape index: {}]   ;;  %s3757_s2 = inlined_call_operand.vmem [shape: f32[32,32], index: 2, kind: input, shape index: {}]   ;;  %s3758_s3 = inlined_call_operand.vmem [shape: f32[32,32], index: 3, kind: input, shape index: {}]   ;;  %s3759_s4 = inlined_call_operand.vmem [shape: f32[32,32], index: 4, kind: input, shape index: {}]   ;;  %s3760_s5 = inlined_call_operand.vmem [shape: f32[1,32], index: 5, kind: input, shape index: {}]   ;;  %s3761_s6 = inlined_call_operand.vmem [shape: f32[1,32], index: 6, kind: input, shape index: {}]   ;;  %s3762_s7 = inlined_call_operand.vmem [shape: f32[1,32], index: 7, kind: input, shape index: {}]   ;;  %s3763_s8 = inlined_call_operand.hbm [shape: f32[32,32], index: 8, kind: input, shape index: {}]   ;;  %s3764_s9 = inlined_call_operand.vmem [shape: f32[1,32], index: 9, kind: input, shape index: {}]   ;;  %s3765_s10 = inlined_call_operand.hbm [shape: f32[32,64], index: 10, kind: input, shape index: {}]   ;;  %s3766_s11 = inlined_call_operand.vmem [shape: f32[1,64], index: 11, kind: input, shape index: {}]   ;;  %s3767_s12 = inlined_call_operand.vmem [shape: f32[64,32], index: 12, kind: input, shape index: {}]   ;;  %s3768_s13 = inlined_call_operand.vmem [shape: f32[1,32], index: 13, kind: input, shape index: {}]   ;;  %s3769_s14 = inlined_call_operand.vmem [shape: f32[1,32], index: 14, kind: input, shape index: {}]   ;;  %s3770_s15 = inlined_call_operand.vmem [shape: f32[1,32], index: 15, kind: input, shape index: {}]   ;;  %s3771_s16 = inlined_call_operand.vmem [shape: f32[1,32], index: 16, kind: input, shape index: {}]   ;;  %s3772_s17 = inlined_call_operand.vmem [shape: f32[1,32], index: 17, kind: input, shape index: {}]   ;;  %s3773_s18 = inlined_call_operand.hbm [shape: f32[2,8,32], index: 18, kind: output, shape index: {}]  }
   0x1   :  { %3783 = sst [smem:[#allocation22_spill]] %s3755_s0 }
   0x2   :  { %3784 = sst [smem:[#allocation23_spill]] %s3756_s1 }
   0x3   :  { %3785 = sst [smem:[#allocation24_spill]] %s3757_s2 }
   0x4   :  { %3786 = sst [smem:[#allocation25_spill]] %s3758_s3 }
   0x5   :  { %3787 = sst [smem:[#allocation26_spill]] %s3763_s8 }
   0x6   :  { %3788 = sst [smem:[#allocation27_spill]] %s3765_s10 }
   0x7   :  { %3789 = sst [smem:[#allocation28_spill]] %s3766_s11 }
   0x8   :  { %3790 = sst [smem:[#allocation29_spill]] %s3768_s13 }
   0x9   :  { %3791 = sst [smem:[#allocation30_spill]] %s3771_s16 }
   0xa   :  { %3792 = sst [smem:[#allocation31_spill]] %s3772_s17 }
   0xb   :  { %3793 = sst [smem:[#allocation32_spill]] %s3773_s18 }
   0xc   :  { %23 = vsyncpa [#allocation3], 0 }
   0xd   :  { %25 = vsyncpa [#allocation3 + $0x1], 0 }
   0xe   :  { %26 = vsyncpa [#allocation6], 0 }
   0xf   :  { %28 = vsyncpa [#allocation6 + $0x1], 0 }
  0x10   :  { %29 = vsyncpa [#allocation9], 0 }
  0x11   :  { %30 = vsyncpa [#allocation4], 0 }
  0x12   :  { %32 = vsyncpa [#allocation4 + $0x1], 0  ;;  %s3273_s27 = smov 0   ;;  %s3275_s28 = smov 0  }
  0x13   :  { %s3277_s29 = smov 0   ;;  %s3279_s30 = smov 0  }
  0x14   :  { %s3281_s0 = smov 0   ;;  %s3283_s19 = smov 0  }
  0x15 LB: > { %3794 = sst [smem:[#allocation16_spill]] %s3139_s27  ;;  %s3304_s1 = sadd.s32 4294967295, %s3159_s19   ;;  %s3159_s19 = sphi %s3283_s19, %s38_s19   ;;  %s3155_s0 = sphi %s3281_s0, %s3829_s0   ;;  %s3151_s30 = sphi %s3279_s30, %s3828_s30   ;;  %s3147_s29 = sphi %s3277_s29, %s3832_s29   ;;  %s3143_s28 = sphi %s3275_s28, %s3831_s28   ;;  %s3139_s27 = sphi %s3273_s27, %s3830_s27  }
  0x16   : > { %3795 = sst [smem:[#allocation17_spill]] %s3151_s30  ;;  %s2620_s20 = sadd.s32 4294967294, %s3159_s19  }
  0x17   : > { %3796 = sst [smem:[#allocation18_spill]] %s3155_s0  ;;  %p72_p0 = scmp.ne.s32.totalorder %s3143_s28, %s3139_s27 }
  0x18   : > { %p3778_p1 = scmp.eq.s32.totalorder %s3304_s1, 0  ;;  %p466_p3 = scmp.eq.s32.totalorder %s2620_s20, 1 }
  0x19   : > { %p2621_p5 = scmp.ge.s32.totalorder %s3159_s19, 1  ;;  %p473_p7 = scmp.lt.s32.totalorder %s3159_s19, 3 }
  0x1a   : > { %p3313_p4 = por %p3778_p1, %p72_p0  ;;  %p3318_p6 = por %p466_p3, %p72_p0 }
  0x1b   : > { %p3323_p8 = pnand %p2621_p5, %p473_p7  ;;  %s3161_s23 = smov [#allocation7]  }
  0x1c   : > { %s3798_s22 = scalar_select %p3318_p6, 1, 0 }
  0x1d   : > { %s503_s24 = sshll.u32 %s3161_s23, 4  ;;  %p2853_p9 = pneg %p3323_p8  ;;  %s504_s24 = int_to_ptr.vmem [resolvable:$true] %s503_s24 }
  0x1e   : > { %3799 = sst [smem:[#allocation19_spill]] %s3798_s22  ;;  %s3162_s26 = smov [#allocation8]  }
  0x1f   : > { %p3332_p11 = pnand %p2853_p9, %p3778_p1  ;;  %s519_s20 = sshll.u32 %s3162_s26, 4  ;;  %s520_s20 = int_to_ptr.vmem [resolvable:$true] %s519_s20 }
  0x20   : > { %s2970_s22 = scalar_lea.vmem %s504_s24, 512  ;;  %p2978_p5 = scmp.lt.s32.totalorder %s504_s24, %s504_s24 }
  0x21   : > { %p2961_p12 = pneg %p3332_p11  ;;  %p2971_p13 = scmp.ne.s32.totalorder %s504_s24, %s2970_s22 }
  0x22   : > { %p2979_p7 = scmp.lt.s32.totalorder %s2970_s22, %s2970_s22 }
  0x23   : > { %p2973_p0 = pnand %p2971_p13, %p2961_p12 }
  0x24   : > { %p2980_p10 = por %p2979_p7, %p2978_p5 }
  0x25   : > { %p2974_p3 = pneg %p2973_p0 }
  0x27   : > { %p2981_p9 = pnand %p2980_p10, %p2974_p3 }
  0x29   : > { %2984 = shalt.err (!%p2981_p9)
}
  0x2a   : > { %s3163_s23 = smov 128   ;;  %s3164_s27 = smov 8  }
  0x2b   : > { %s3802_s8 = sld [smem:[#allocation26_spill]]  ;;  %s2996_s17 = scalar_lea.vmem %s520_s20, 512 }
  0x2c   : > { %p2997_p1 = scmp.ne.s32.totalorder %s520_s20, %s2996_s17  ;;  %p3004_p2 = scmp.lt.s32.totalorder %s520_s20, %s520_s20 }
  0x2d   : > { %p3005_p6 = scmp.lt.s32.totalorder %s2996_s17, %s2996_s17 }
  0x2e   : > { %p2999_p13 = pnand %p2997_p1, %p2961_p12 }
  0x2f   : > { %p3006_p5 = por %p3005_p6, %p3004_p2 }
  0x30   : > { %p3000_p0 = pneg %p2999_p13 }
  0x31   : > { %2856 = dma.hbm_to_vmem [thread:$0]  (!%p3332_p11), %s3802_s8, 512, %s504_s24, [#allocation6], %s3163_s23, %s3163_s23, %s3164_s27  }
  0x32   : > { %p3007_p10 = pnand %p3006_p5, %p3000_p0 }
  0x34   : > { %3010 = shalt.err (!%p3007_p10)
}
  0x35   : > { %s3803_s10 = sld [smem:[#allocation27_spill]]  ;;  %s50_s17 = sadd.s32 1, %s3155_s0 }
  0x36   : > { %s59_s18 = sadd.s32 1, %s3147_s29  ;;  %p52_p1 = scmp.ge.s32.totalorder %s50_s17, 2 }
  0x37   : > { %p66_p2 = scmp.ne.s32.totalorder %s3147_s29, %s3143_s28  ;;  %p67_p6 = scmp.eq.s32.totalorder %s3159_s19, 0 }
  0x38   : > { %p2873_p12 = scmp.lt.s32.totalorder %s3159_s19, 2  ;;  %s3834_s17 = smov (%p52_p1, %s50_s17), 0 }
  0x39   : > { %3804 = sst [smem:[#allocation20_spill]] %s3834_s17  ;;  %p68_p3 = por %p67_p6, %p66_p2 }
  0x3a   : > { %p3805_p7 = scmp.eq.s32.totalorder %s3304_s1, 1  ;;  %s54_s24 = ssub.s32 %s3155_s0, %s3834_s17 }
  0x3b   : > { %2859 = dma.hbm_to_vmem [thread:$0]  (!%p3332_p11), %s3803_s10, 512, %s520_s20, [#allocation9], %s3163_s23, %s3163_s23, %s3164_s27  }
  0x3c   : > { %p3364_p9 = por %p3805_p7, %p66_p2  ;;  %s554_s25 = sand.u32 1, %s3147_s29  }
  0x3d   : > { %p57_p13 = scmp.eq.s32.totalorder %s54_s24, 0  ;;  %s2625_s27 = sshll.u32 %s554_s25, 3 }
  0x3e   : > { %s3806_s16 = scalar_select %p3364_p9, 1, 0 }
  0x3f   : > { %s2626_s20 = sshll.u32 %s3155_s0, 7  ;;  %s3808_s8 = sld [smem:[#allocation22_spill]] }
  0x40   : > { %3807 = sst [smem:[#allocation21_spill]] %s3806_s16  ;;  %s558_s30 = scalar_lea.vmem [#allocation2], %s2625_s27 }
  0x41   : > { %s3373_s23 = scalar_select %p57_p13, %s3147_s29, %s59_s18  }
  0x42   : > { %s566_s13 = sshll.u32 %s558_s30, 4  ;;  %p3380_p11 = pnand %p2873_p12, %p68_p3  ;;  %s567_s13 = int_to_ptr.vmem [resolvable:$true] %s566_s13 }
  0x43   : > { %s3810_s16 = sld [smem:[#allocation23_spill]]  ;;  %s555_s18 = scalar_lea.sflag [#allocation3], %s554_s25 }
  0x44   : > { %p3013_p0 = pneg %p3380_p11  ;;  %s3024_s26 = scalar_lea.vmem %s567_s13, 128 }
  0x45   : > { %s564_s10 = scalar_lea.hbm %s3808_s8, %s2626_s20  ;;  %p3025_p5 = scmp.ne.s32.totalorder %s567_s13, %s3024_s26 }
  0x46   : > { %s3165_s8 = smov [#allocation2]  }
  0x47   : > { %p3027_p10 = pnand %p3025_p5, %p3013_p0  ;;  %s3029_s30 = sshll.u32 %s3165_s8, 4  ;;  %s3030_s30 = int_to_ptr.vmem [resolvable:$false] %s3029_s30 }
  0x48   : > { %s3031_s22 = scalar_lea.vmem %s3030_s30, 256  ;;  %p3032_p2 = scmp.lt.s32.totalorder %s567_s13, %s3030_s30 }
  0x49   : > { %s3387_s0 = scalar_lea.hbm %s3810_s16, %s2626_s20  ;;  %p3028_p1 = pneg %p3027_p10 }
  0x4a   : > { %p3033_p6 = scmp.lt.s32.totalorder %s3031_s22, %s3024_s26 }
  0x4c   : > { %p3034_p12 = por %p3033_p6, %p3032_p2 }
  0x4e   : > { %p3035_p3 = pnand %p3034_p12, %p3028_p1 }
  0x50   : > { %3038 = shalt.err (!%p3035_p3)
}
  0x51   : > { %2863 = dma.hbm_to_vmem [thread:$0]  (!%p3380_p11), %s564_s10, 128, %s567_s13, %s555_s18  }
  0x52   : > { %s573_s17 = sand.u32 1, %s3159_s19   ;;  %s577_s16 = scalar_lea.vmem [#allocation5], %s2625_s27 }
  0x53   : > { %s584_s25 = sshll.u32 %s577_s16, 4  ;;  %s574_s20 = scalar_lea.sflag [#allocation6], %s573_s17  ;;  %s585_s25 = int_to_ptr.vmem [resolvable:$true] %s584_s25 }
  0x54   : > { %s3052_s24 = scalar_lea.vmem %s585_s25, 128  ;;  %s3166_s26 = smov [#allocation5]  }
  0x55   : > { %p3053_p7 = scmp.ne.s32.totalorder %s585_s25, %s3052_s24  ;;  %s3057_s8 = sshll.u32 %s3166_s26, 4  ;;  %s3058_s8 = int_to_ptr.vmem [resolvable:$false] %s3057_s8 }
  0x56   : > { %s3059_s30 = scalar_lea.vmem %s3058_s8, 256  ;;  %p3060_p10 = scmp.lt.s32.totalorder %s585_s25, %s3058_s8 }
  0x57   : > { %p3055_p13 = pnand %p3053_p7, %p3013_p0  ;;  %p3061_p1 = scmp.lt.s32.totalorder %s3059_s30, %s3052_s24 }
  0x59   : > { %p3056_p5 = pneg %p3055_p13  ;;  %p3062_p2 = por %p3061_p1, %p3060_p10 }
  0x5b   : > { %p3063_p6 = pnand %p3062_p2, %p3056_p5 }
  0x5d   : > { %3066 = shalt.err (!%p3063_p6)
}
  0x5e   : > { %2866 = dma.hbm_to_vmem [thread:$0]  (!%p3380_p11), %s3387_s0, 128, %s585_s25, %s574_s20  }
  0x5f   : > { %593 = sbr.rel (%p3323_p8) target bundleno = 2547 (0x9f3), region = 92  ;;  %s3406_s10 = sand.u32 (!%p3323_p8), 1, %s3143_s28  }
  0x60   : > { %s3409_s13 = sshll.u32 (!%p3323_p8), %s3406_s10, 3  ;;  %s596_s27 = scalar_lea.sflag (!%p3323_p8), [#allocation3], %s3406_s10 }
  0x61   : > { %s599_s18 = scalar_lea.vmem (!%p3323_p8), [#allocation2], %s3409_s13 }
  0x64   : > { %3118 = dma.done.wait (%p3313_p4), %s596_s27, 128  }
  0x65   : > { %3120 = vsyncadd (%p3313_p4), %s596_s27, 4294967168  ;;  %s604_s11 = sand.u32 1, %s3304_s1   ;;  %s608_s2 = scalar_lea.vmem [#allocation5], %s3409_s13 }
  0x66   : > { %s605_s0 = scalar_lea.sflag [#allocation6], %s604_s11 }
  0x67   : > { %3122 = dma.done.wait (%p3313_p4), %s605_s0, 128  }
  0x68   : > { %3124 = vsyncadd (%p3313_p4), %s605_s0, 4294967168  ;;  %p3811_p8 = scmp.eq.s32.totalorder %s3304_s1, 0 }
  0x6a   : > { %3126 = dma.done.wait (%p3811_p8), [#allocation6], 512   ;;  %p3812_p11 = pmov %p3811_p8 }
  0x6b   : > { %p3813_p0 = pmov %p3811_p8 }
  0x6c   : > { %3128 = vsyncadd (%p3812_p11), [#allocation6], 4294966784 }
  0x6d   : > { %3130 = dma.done.wait (%p3813_p0), [#allocation9], 512   ;;  %p3814_p12 = pmov %p3813_p0 }
  0x6e   : > { %v3167_v0 = vmov 0.0   ;;  %vm3168_vm0 = vmmov 0   ;;  %s3815_s17 = sld [smem:[#allocation24_spill]]  ;;  %v3451_v5 = vld [vmem:[%s599_s18] sm:$0xff]  ;;  %vm687_vm1 = vcmask 261120   ;;  %v675_v10 = vld [vmem:[%s608_s2] sm:$0xff]  ;;  %v941_v25 = vlaneseq }
  0x6f   : > { %3132 = vsyncadd (%p3814_p12), [#allocation9], 4294966784  ;;  %2725 = vmatprep.subr.mxu1 %v3167_v0  ;;  %2733 = vmatprep.mubr.msk.f32.mxu1 %vm3168_vm0, %v3167_v0  ;;  %s3816_s3 = sld [smem:[#allocation25_spill]]  ;;  %v2635_v11 = vld [vmem:[%s3760_s5] ss:$0 sm:$0xff]  ;;  %s3169_s1 = smov 120  }
  0x70   : > { %2747 = vmatprep.subr.mxu0 %v3167_v0  ;;  %2755 = vmatprep.mubr.msk.f32.mxu0 %vm3168_vm0, %v3167_v0  ;;  %v2637_v15 = vld [vmem:[%s3761_s6] ss:$0 sm:$0xff]  ;;  %s3170_s24 = smov 104   ;;  %v848_v19 = vld [vmem:[%s3759_s4 + $0x18] sm:$0xff]  ;;  %v847_v20 = vld [vmem:[%s3759_s4 + $0x10] sm:$0xff]  ;;  %s3171_s11 = smov 112  }
  0x71   : > { %2748 = vmatpush3.msra.mxu0 %v848_v19  ;;  %v846_v21 = vld [vmem:[%s3759_s4 + $0x8] sm:$0xff]  ;;  %v845_v22 = vld [vmem:[%s3759_s4] sm:$0xff]  ;;  %v3172_v23 = vmov 1983009808   ;;  %v3173_v27 = vmov 1934713408  }
  0x72   : > { %2749 = vmatprep.subr.mxu0 %v3167_v0  ;;  %v939_v24 = vunpack.c.l.s4 %v3172_v23  ;;  %v971_v28 = vunpack.c.l.s4 %v3173_v27  ;;  %v942_v30 = vshrl.u32 %v941_v25, 7  ;;  %vm1364_vm2 = vcmask 64512   ;;  %s3175_s2 = smov 8   ;;  %s3176_s20 = smov 24  }
  0x73   : > { %2750 = vmatpush3.msra.mxu0 %v847_v20  ;;  %vm2158_vm3 = vcmask 130048   ;;  %vm2160_vm4 = vcmask 195584   ;;  %s3817_s22 = sld [smem:[#allocation28_spill]]  ;;  %vm2377_vm5 = vcmask 523264   ;;  %s673_s0 = scalar_lea.vmem [#allocation10], %s3409_s13 }
  0x74   : > { %v679_v1 = vld [vmem:[%s3815_s17 + $0x18] sm:$0xff]  ;;  %v678_v2 = vld [vmem:[%s3815_s17 + $0x10] sm:$0xff]  ;;  %v677_v3 = vld [vmem:[%s3815_s17 + $0x8] sm:$0xff]  ;;  %2751 = vmatprep.subr.mxu0 %v3167_v0  ;;  %v940_v29 = vunpack.c.0.s8 %v939_v24  ;;  %v972_v33 = vunpack.c.0.s8 %v971_v28  ;;  %s3821_s8 = sld [smem:[#allocation30_spill]]  ;;  %s2497_s21 = sshll.u32 %s673_s0, 4  ;;  %s2498_s21 = int_to_ptr.vmem [resolvable:$true] %s2497_s21 }
  0x75   : > { %2726 = vmatpush3.msra.mxu1 %v679_v1  ;;  %v676_v4 = vld [vmem:[%s3815_s17] sm:$0xff]  ;;  %v764_v6 = vld [vmem:[%s3816_s3 + $0x18] sm:$0xff]  ;;  %v763_v7 = vld [vmem:[%s3816_s3 + $0x10] sm:$0xff]  ;;  %2752 = vmatpush3.msra.mxu0 %v846_v21  ;;  %s3823_s25 = sld [smem:[#allocation32_spill]]  ;;  %s3177_s26 = smov [#allocation10]  }
  0x76   : > { %2727 = vmatprep.subr.mxu1 %v3167_v0  ;;  %v762_v8 = vld [vmem:[%s3816_s3 + $0x8] sm:$0xff]  ;;  %v761_v9 = vld [vmem:[%s3816_s3] sm:$0xff]  ;;  %2753 = vmatprep.subr.mxu0 %v3167_v0  ;;  %v3516_v34 = vsub.s32 %v940_v29, %v942_v30  ;;  %v3518_v41 = vsub.s32 %v972_v33, %v942_v30  ;;  %s2483_s3 = scalar_lea.sflag [#allocation4], %s3406_s10 }
  0x77   : > { %2728 = vmatpush3.msra.mxu1 %v678_v2  ;;  %2754 = vmatpush3.msra.mxu0 %v845_v22 }
  0x78   : > { %2729 = vmatprep.subr.mxu1 %v3167_v0  ;;  %2768 = vmatprep.subr.mxu0 %v3167_v0 }
  0x79   : > { %2730 = vmatpush3.msra.mxu1 %v677_v3  ;;  %2756 = vmatmul.mubr.msk.f32.vlgmr.msra.gmra.mxu0 %vm687_vm1, %v675_v10 }
  0x7a   : > { %2731 = vmatprep.subr.mxu1 %v3167_v0  ;;  %2770 = vmatprep.mubr.msk.f32.mxu0 %vm3168_vm0, %v3167_v0 }
  0x7b   : > { %2732 = vmatpush3.msra.mxu1 %v676_v4 }
  0x7c   : > { %2734 = vmatmul.mubr.msk.f32.vlgmr.msra.gmra.mxu1 %vm687_vm1, %v3451_v5  ;;  %2736 = vmatprep.subr.mxu1 %v3167_v0 }
  0x7d   : > { %2737 = vmatpush3.msra.mxu1 %v764_v6  ;;  %2744 = vmatprep.mubr.msk.f32.mxu1 %vm3168_vm0, %v3167_v0 }
  0x7e   : > { %2738 = vmatprep.subr.mxu1 %v3167_v0 }
  0x7f   : > { %2739 = vmatpush3.msra.mxu1 %v763_v7 }
  0x80   : > { %2740 = vmatprep.subr.mxu1 %v3167_v0 }
  0x81   : > { %2741 = vmatpush3.msra.mxu1 %v762_v8 }
  0x82   : > { %2742 = vmatprep.subr.mxu1 %v3167_v0 }
  0x83   : > { %2743 = vmatpush3.msra.mxu1 %v761_v9 }
  0x84   : > { %2745 = vmatmul.mubr.msk.f32.vlgmr.msra.gmra.mxu1 %vm687_vm1, %v675_v10  ;;  %2758 = vmatprep.subr.mxu1 %v3167_v0 }
  0x85   : > { %2760 = vmatprep.mubr.msk.f32.mxu1 %vm3168_vm0, %v3167_v0 }
 0x13c   : > { %v757_v12 = vpop.f32.mrf.mxu1 }
 0x13d   : > { %v3483_v13 = vadd.f32 %v2635_v11, %v757_v12 }
 0x13e   : > { %v2735_v14 = vpop.f32.mrf.mxu1 }
 0x13f   : > { %927 = vrot.lane.b32.xlu1 %v3483_v13, %s3169_s1 }
 0x144   : > { %v841_v16 = vpop.f32.mrf.mxu1 }
 0x145   : > { %v842_v17 = vadd.f32 %v2637_v15, %v841_v16 }
 0x146   : > { %v2746_v18 = vpop.f32.mrf.mxu1 }
 0x147   : > { %1079 = vrot.lane.b32.xlu1 %v842_v17, %s3170_s24  ;;  %1073 = vrot.lane.b32.xlu0 %v842_v17, %s3169_s1 }
 0x14b   : > { %933 = vrot.lane.b32.xlu1 %v3483_v13, %s3170_s24  ;;  %1076 = vrot.lane.b32.xlu0 %v842_v17, %s3171_s11 }
 0x14f   : > { %930 = vrot.lane.b32.xlu0 %v3483_v13, %s3171_s11 }
 0x1b1   : > { %v928_v26 = vpop.permute.xlu1 %927 }
 0x1b9   : > { %v1080_v31 = vpop.permute.xlu1 %1079  ;;  %v1074_v32 = vpop.permute.xlu0 %1073 }
 0x1ba   : > { %v1098_v35 = vcombine.low %v1074_v32, %v1080_v31  ;;  %v1099_v36 = vcombine.high %v1074_v32, %v1080_v31 }
 0x1bc   : > { %v1106_v42 = vrot.slane %v1098_v35, %v3516_v34  ;;  %v1113_v43 = vrot.slane %v1099_v36, %v3516_v34 }
 0x1bd   : > { %v1077_v37 = vpop.permute.xlu0 %1076  ;;  %v934_v38 = vpop.permute.xlu1 %933 }
 0x1be   : > { %v1082_v39 = vcombine.low %v842_v17, %v1077_v37  ;;  %v1083_v40 = vcombine.high %v842_v17, %v1077_v37  ;;  %v952_v46 = vcombine.low %v928_v26, %v934_v38  ;;  %v953_v47 = vcombine.high %v928_v26, %v934_v38 }
 0x1c0   : > { %v1090_v44 = vrot.slane %v1082_v39, %v3516_v34  ;;  %v1097_v45 = vrot.slane %v1083_v40, %v3516_v34  ;;  %v960_v59 = vrot.slane %v952_v46, %v3516_v34  ;;  %v967_v60 = vrot.slane %v953_v47, %v3516_v34 }
 0x1c1   : > { %v931_v48 = vpop.permute.xlu0 %930 }
 0x1c2   : > { %v1114_v49 = vcombine.low %v1090_v44, %v1106_v42  ;;  %v1115_v50 = vcombine.high %v1090_v44, %v1106_v42  ;;  %v1130_v51 = vcombine.low %v1097_v45, %v1113_v43  ;;  %v1131_v52 = vcombine.high %v1097_v45, %v1113_v43 }
 0x1c3   : > { %v936_v53 = vcombine.low %v3483_v13, %v931_v48  ;;  %v937_v54 = vcombine.high %v3483_v13, %v931_v48 }
 0x1c4   : > { %v1122_v55 = vrot.slane %v1114_v49, %v3518_v41  ;;  %v1129_v56 = vrot.slane %v1115_v50, %v3518_v41  ;;  %v1138_v57 = vrot.slane %v1130_v51, %v3518_v41  ;;  %v1145_v58 = vrot.slane %v1131_v52, %v3518_v41  ;;  %v922_v51 = vpop.f32.mrf.mxu0 }
 0x1c5   : > { %v944_v61 = vrot.slane %v936_v53, %v3516_v34  ;;  %v951_v62 = vrot.slane %v937_v54, %v3516_v34 }
 0x1c6   : > { %v1150_v63 = vcombine.low %v1122_v55, %v1129_v56  ;;  %v2643_v1 = vcombine.high %v1122_v55, %v1129_v56  ;;  %v1166_v2 = vcombine.low %v1138_v57, %v1145_v58  ;;  %v2644_v3 = vcombine.high %v1138_v57, %v1145_v58  ;;  %v2757_v52 = vpop.f32.mrf.mxu0 }
 0x1c7   : > { %v968_v4 = vcombine.low %v944_v61, %v960_v59  ;;  %v969_v6 = vcombine.high %v944_v61, %v960_v59  ;;  %v984_v7 = vcombine.low %v951_v62, %v967_v60  ;;  %v985_v8 = vcombine.high %v951_v62, %v967_v60 }
 0x1c8   : > { %v1157_v9 = vrot.slane %v1150_v63, %v3516_v34  ;;  %v1165_v10 = vrot.slane %v2643_v1, %v3516_v34  ;;  %v1173_v11 = vrot.slane %v1166_v2, %v3516_v34  ;;  %v1181_v12 = vrot.slane %v2644_v3, %v3516_v34 }
 0x1c9   : > { %v976_v13 = vrot.slane %v968_v4, %v3518_v41  ;;  %v983_v14 = vrot.slane %v969_v6, %v3518_v41  ;;  %v992_v15 = vrot.slane %v984_v7, %v3518_v41  ;;  %v999_v16 = vrot.slane %v985_v8, %v3518_v41  ;;  %v2639_v7 = vld [vmem:[%s3762_s7] ss:$0 sm:$0xff] }
 0x1ca   : > { %v1182_v17 = vcombine.low %v1157_v9, %v1165_v10  ;;  %v1183_v18 = vcombine.high %v1157_v9, %v1165_v10  ;;  %v1198_v19 = vcombine.low %v1173_v11, %v1181_v12  ;;  %v1199_v20 = vcombine.high %v1173_v11, %v1181_v12 }
 0x1cb   : > { %v1004_v21 = vcombine.low %v976_v13, %v983_v14  ;;  %v2641_v22 = vcombine.high %v976_v13, %v983_v14  ;;  %v1020_v23 = vcombine.low %v992_v15, %v999_v16  ;;  %v2642_v24 = vcombine.high %v992_v15, %v999_v16 }
 0x1cc   : > { %v1190_v25 = vrot.slane %v1182_v17, %v3518_v41  ;;  %v1206_v26 = vrot.slane %v1198_v19, %v3518_v41  ;;  %v1197_v27 = vrot.slane %v1183_v18, %v3518_v41  ;;  %v1213_v28 = vrot.slane %v1199_v20, %v3518_v41 }
 0x1cd   : > { %v1011_v29 = vrot.slane %v1004_v21, %v3516_v34  ;;  %v1019_v30 = vrot.slane %v2641_v22, %v3516_v34  ;;  %v1027_v31 = vrot.slane %v1020_v23, %v3516_v34  ;;  %v1035_v32 = vrot.slane %v2642_v24, %v3516_v34 }
 0x1ce   : > { %v1214_v33 = vcombine.low %v1190_v25, %v1206_v26  ;;  %v1216_v35 = vcombine.low %v1197_v27, %v1213_v28  ;;  %v1215_v47 = vcombine.high %v1190_v25, %v1206_v26  ;;  %v1217_v49 = vcombine.high %v1197_v27, %v1213_v28 }
 0x1cf   : > { %v1036_v36 = vcombine.low %v1011_v29, %v1019_v30  ;;  %v1037_v37 = vcombine.high %v1011_v29, %v1019_v30  ;;  %v1052_v38 = vcombine.low %v1027_v31, %v1035_v32  ;;  %v1053_v39 = vcombine.high %v1027_v31, %v1035_v32 }
 0x1d0   : > { %2759 = vmatpush3.xpose.msk.msra.mxu1 %vm1364_vm2, %v1214_v33  ;;  %2769 = vmatpush3.xpose.msk.msra.mxu0 %vm1364_vm2, %v1216_v35  ;;  %v923_v8 = vadd.f32 %v2639_v7, %v922_v51 }
 0x1d1   : > { %2763 = vmatprep.subr.mxu1 %v3167_v0  ;;  %v1044_v40 = vrot.slane %v1036_v36, %v3518_v41  ;;  %v1060_v42 = vrot.slane %v1052_v38, %v3518_v41  ;;  %v1051_v43 = vrot.slane %v1037_v37, %v3518_v41  ;;  %v1067_v44 = vrot.slane %v1053_v39, %v3518_v41 }
 0x1d2   : > { %2778 = vmatprep.subr.mxu0 %v3167_v0 }
 0x1d3   : > { %v1068_v45 = vcombine.low %v1044_v40, %v1060_v42  ;;  %v1070_v46 = vcombine.low %v1051_v43, %v1067_v44  ;;  %v1069_v48 = vcombine.high %v1044_v40, %v1060_v42  ;;  %v1071_v50 = vcombine.high %v1051_v43, %v1067_v44 }
 0x1d5   : > { %2761 = vmatmul.mubr.msk.f32.vlgmr.msra.gmra.mxu1 %vm1364_vm2, %v1068_v45  ;;  %2771 = vmatmul.mubr.msk.f32.vlgmr.msra.gmra.mxu0 %vm1364_vm2, %v1070_v46 }
 0x1d6   : > { %2764 = vmatpush3.xpose.msk.msra.mxu1 %vm1364_vm2, %v1215_v47  ;;  %2765 = vmatprep.mubr.msk.f32.mxu1 %vm3168_vm0, %v3167_v0 }
 0x1d7   : > { %2773 = vmatprep.subr.mxu1 %v3167_v0  ;;  %2780 = vmatprep.mubr.msk.f32.mxu0 %vm3168_vm0, %v3167_v0 }
 0x1d9   : > { %2766 = vmatmul.mubr.msk.f32.vlgmr.msra.gmra.mxu1 %vm1364_vm2, %v1069_v48 }
 0x1da   : > { %2774 = vmatpush3.xpose.msk.msra.mxu1 %vm1364_vm2, %v1217_v49  ;;  %2775 = vmatprep.mubr.msk.f32.mxu1 %vm3168_vm0, %v3167_v0 }
 0x1db   : > { %2783 = vmatprep.subr.mxu1 %v3167_v0 }
 0x1dd   : > { %2776 = vmatmul.mubr.msk.f32.vlgmr.msra.gmra.mxu1 %vm1364_vm2, %v1071_v50 }
 0x1de   : > { %2785 = vmatprep.mubr.msk.f32.mxu1 %vm3168_vm0, %v3167_v0 }
 0x295   : > { %v1437_v53 = vpop.f32.mrf.mxu1  ;;  %v1589_v54 = vpop.f32.mrf.mxu0 }
 0x296   : > { %v1669_v55 = vmul.f32 0.35355338, %v1437_v53  ;;  %v1671_v58 = vmul.f32 0.35355338, %v1589_v54 }
 0x297   : > { %v2762_v56 = vpop.f32.mrf.mxu1  ;;  %v2772_v57 = vpop.f32.mrf.mxu0 }
 0x298   : > { %v1673_v59 = vsel %vm1364_vm2, %v1669_v55, -inf  ;;  %v1679_v63 = vsel %vm1364_vm2, %v1671_v58, -inf }
 0x299   : > { %1674 = vmax.xlane.f32.xlu0 %v1673_v59  ;;  %v1513_v60 = vpop.f32.mrf.mxu1 }
 0x29a   : > { %v1670_v61 = vmul.f32 0.35355338, %v1513_v60 }
 0x29b   : > { %v2767_v62 = vpop.f32.mrf.mxu1 }
 0x29c   : > { %v1676_v1 = vsel %vm1364_vm2, %v1670_v61, -inf }
 0x29d   : > { %1680 = vmax.xlane.f32.xlu0 %v1679_v63  ;;  %1677 = vmax.xlane.f32.xlu1 %v1676_v1  ;;  %v1665_v2 = vpop.f32.mrf.mxu1 }
 0x29e   : > { %v1672_v3 = vmul.f32 0.35355338, %v1665_v2 }
 0x29f   : > { %v2777_v4 = vpop.f32.mrf.mxu1 }
 0x2a0   : > { %v1682_v6 = vsel %vm1364_vm2, %v1672_v3, -inf }
 0x2a1   : > { %1683 = vmax.xlane.f32.xlu0 %v1682_v6 }
 0x2ae   : > { %1219 = vrot.lane.b32.xlu1 %v923_v8, %s3169_s1  ;;  %s3174_s1 = smov 16  }
 0x322   : > { %v1675_v9 = vpop.xlane.xlu0 %1674 }
 0x323   : > { %v1685_v10 = vsub.f32 %v1669_v55, %v1675_v9 }
 0x325   : > { %v1689_v11 = vmul.f32 1.442695, %v1685_v10 }
 0x326   : > { %v1681_v12 = vpop.xlane.xlu0 %1680  ;;  %v1678_v13 = vpop.xlane.xlu1 %1677 }
 0x327   : > { %2939 = vpow2.f32 %v1689_v11  ;;  %v1687_v14 = vsub.f32 %v1671_v58, %v1681_v12  ;;  %v1686_v15 = vsub.f32 %v1670_v61, %v1678_v13 }
 0x329   : > { %v1693_v16 = vmul.f32 1.442695, %v1687_v14  ;;  %v1691_v17 = vmul.f32 1.442695, %v1686_v15 }
 0x32a   : > { %v1684_v18 = vpop.xlane.xlu0 %1683  ;;  %v1220_v29 = vpop.permute.xlu1 %1219 }
 0x32b   : > { %2941 = vpow2.f32 %v1693_v16  ;;  %v1688_v19 = vsub.f32 %v1672_v3, %v1684_v18 }
 0x32c   : > { %2943 = vpow2.f32 %v1691_v17 }
 0x32d   : > { %v1695_v20 = vmul.f32 1.442695, %v1688_v19 }
 0x32f   : > { %2945 = vpow2.f32 %v1695_v20  ;;  %v2165_v20 = vld [vmem:[#allocation7 + $0x18] sm:$0xff] }
 0x334   : > { %v2940_v21 = vpop.eup %2939 }
 0x335   : > { %v1697_v22 = vsel %vm1364_vm2, %v2940_v21, 0.0 }
 0x336   : > { %1698 = vadd.xlane.f32.xlu1 %v1697_v22 }
 0x338   : > { %v3583_v23 = vpop.eup %2941 }
 0x339   : > { %v2944_v24 = vpop.eup %2943  ;;  %v1703_v25 = vsel %vm1364_vm2, %v3583_v23, 0.0 }
 0x33a   : > { %1704 = vadd.xlane.f32.xlu1 %v1703_v25  ;;  %v1700_v26 = vsel %vm1364_vm2, %v2944_v24, 0.0 }
 0x33b   : > { %1701 = vadd.xlane.f32.xlu0 %v1700_v26 }
 0x33c   : > { %v3588_v27 = vpop.eup %2945 }
 0x33d   : > { %v1706_v28 = vsel %vm1364_vm2, %v3588_v27, 0.0 }
 0x33f   : > { %1707 = vadd.xlane.f32.xlu0 %v1706_v28 }
 0x34b   : > { %1225 = vrot.lane.b32.xlu1 %v923_v8, %s3170_s24  ;;  %s3067_s24 = scalar_lea.vmem %s2498_s21, 128 }
 0x34c   : > { %p3068_p4 = scmp.ne.s32.totalorder %s2498_s21, %s3067_s24 }
 0x34e   : > { %p3069_p3 = pnand %p3068_p4, %p3364_p9 }
 0x350   : > { %p3070_p7 = pneg %p3069_p3 }
 0x355   : > { %1222 = vrot.lane.b32.xlu0 %v923_v8, %s3171_s11  ;;  %s3822_s11 = sld [smem:[#allocation31_spill]] }
 0x3bf   : > { %v1699_v30 = vpop.xlane.xlu1 %1698 }
 0x3c0   : > { %2947 = vrcp.f32 %v1699_v30 }
 0x3c3   : > { %v1705_v31 = vpop.xlane.xlu1 %1704 }
 0x3c4   : > { %v1702_v32 = vpop.xlane.xlu0 %1701 }
 0x3c5   : > { %2949 = vrcp.f32 %v1702_v32 }
 0x3c6   : > { %2951 = vrcp.f32 %v1705_v31 }
 0x3c7   : > { %v1226_v33 = vpop.permute.xlu1 %1225 }
 0x3c8   : > { %v1708_v35 = vpop.xlane.xlu0 %1707  ;;  %v1244_v36 = vcombine.low %v1220_v29, %v1226_v33  ;;  %v1245_v37 = vcombine.high %v1220_v29, %v1226_v33 }
 0x3c9   : > { %2953 = vrcp.f32 %v1708_v35 }
 0x3ca   : > { %v1252_v42 = vrot.slane %v1244_v36, %v3516_v34  ;;  %v1259_v43 = vrot.slane %v1245_v37, %v3516_v34 }
 0x3cc   : > { %v1223_v38 = vpop.permute.xlu0 %1222 }
 0x3cd   : > { %v1228_v39 = vcombine.low %v923_v8, %v1223_v38  ;;  %v1229_v40 = vcombine.high %v923_v8, %v1223_v38  ;;  %v2948_v3 = vpop.eup %2947 }
 0x3ce   : > { %v1713_v13 = vmul.f32 %v2948_v3, %v2940_v21 }
 0x3cf   : > { %v1236_v44 = vrot.slane %v1228_v39, %v3516_v34  ;;  %v1243_v45 = vrot.slane %v1229_v40, %v3516_v34 }
 0x3d1   : > { %v1260_v46 = vcombine.low %v1236_v44, %v1252_v42  ;;  %v1261_v47 = vcombine.high %v1236_v44, %v1252_v42  ;;  %v1276_v48 = vcombine.low %v1243_v45, %v1259_v43  ;;  %v1277_v49 = vcombine.high %v1243_v45, %v1259_v43  ;;  %v2164_v43 = vld [vmem:[#allocation7 + $0x10] sm:$0xff]  ;;  %v2163_v44 = vld [vmem:[#allocation7 + $0x8] sm:$0xff] }
 0x3d2   : > { %v2950_v4 = vpop.eup %2949 }
 0x3d3   : > { %v1268_v50 = vrot.slane %v1260_v46, %v3518_v41  ;;  %v1275_v51 = vrot.slane %v1261_v47, %v3518_v41  ;;  %v1284_v52 = vrot.slane %v1276_v48, %v3518_v41  ;;  %v1291_v53 = vrot.slane %v1277_v49, %v3518_v41  ;;  %v2952_v10 = vpop.eup %2951 }
 0x3d4   : > { %v1714_v14 = vmul.f32 %v2950_v4, %v2944_v24  ;;  %v1715_v18 = vmul.f32 %v2952_v10, %v3583_v23 }
 0x3d5   : > { %v1296_v54 = vcombine.low %v1268_v50, %v1275_v51  ;;  %v2645_v55 = vcombine.high %v1268_v50, %v1275_v51  ;;  %v1312_v56 = vcombine.low %v1284_v52, %v1291_v53  ;;  %v2646_v57 = vcombine.high %v1284_v52, %v1291_v53  ;;  %v2162_v53 = vld [vmem:[#allocation7] sm:$0xff] }
 0x3d6   : > { %v2954_v15 = vpop.eup %2953 }
 0x3d7   : > { %v1303_v58 = vrot.slane %v1296_v54, %v3516_v34  ;;  %v1311_v59 = vrot.slane %v2645_v55, %v3516_v34  ;;  %v1319_v60 = vrot.slane %v1312_v56, %v3516_v34  ;;  %v1327_v61 = vrot.slane %v2646_v57, %v3516_v34 }
 0x3d8   : > { %v1716_v19 = vmul.f32 %v2954_v15, %v3588_v27 }
 0x3d9   : > { %v1328_v62 = vcombine.low %v1303_v58, %v1311_v59  ;;  %v1344_v63 = vcombine.low %v1319_v60, %v1327_v61  ;;  %v1329_v1 = vcombine.high %v1303_v58, %v1311_v59  ;;  %v1345_v2 = vcombine.high %v1319_v60, %v1327_v61 }
 0x3db   : > { %v1336_v6 = vrot.slane %v1328_v62, %v3518_v41  ;;  %v1352_v7 = vrot.slane %v1344_v63, %v3518_v41  ;;  %v1343_v8 = vrot.slane %v1329_v1, %v3518_v41  ;;  %v1359_v9 = vrot.slane %v1345_v2, %v3518_v41 }
 0x3dd   : > { %v1360_v11 = vcombine.low %v1336_v6, %v1352_v7  ;;  %v1361_v12 = vcombine.high %v1336_v6, %v1352_v7  ;;  %v1362_v16 = vcombine.low %v1343_v8, %v1359_v9  ;;  %v1363_v17 = vcombine.high %v1343_v8, %v1359_v9 }
 0x3df   : > { %2779 = vmatpush3.msra.mxu0 %v1360_v11  ;;  %2784 = vmatpush3.msra.mxu1 %v1361_v12 }
 0x3e0   : > { %2781 = vmatmul.mubr.msk.f32.vlgmr.msra.gmra.mxu0 %vm1364_vm2, %v1713_v13  ;;  %2786 = vmatmul.mubr.msk.f32.vlgmr.msra.gmra.mxu1 %vm1364_vm2, %v1714_v14 }
 0x3e1   : > { %2788 = vmatprep.subr.mxu0 %v3167_v0  ;;  %2793 = vmatprep.subr.mxu1 %v3167_v0 }
 0x3e2   : > { %2789 = vmatpush3.msra.mxu0 %v1362_v16  ;;  %2794 = vmatpush3.msra.mxu1 %v1363_v17 }
 0x3e3   : > { %2790 = vmatprep.mubr.msk.f32.mxu0 %vm3168_vm0, %v3167_v0  ;;  %2795 = vmatprep.mubr.msk.f32.mxu1 %vm3168_vm0, %v3167_v0 }
 0x3e4   : > { %2791 = vmatmul.mubr.msk.f32.vlgmr.msra.gmra.mxu0 %vm1364_vm2, %v1715_v18  ;;  %2796 = vmatmul.mubr.msk.f32.vlgmr.msra.gmra.mxu1 %vm1364_vm2, %v1716_v19 }
 0x3e5   : > { %2798 = vmatprep.subr.mxu0 %v3167_v0  ;;  %2806 = vmatprep.mubr.msk.f32.mxu0 %vm3168_vm0, %v3167_v0 }
 0x3e6   : > { %2809 = vmatprep.subr.mxu1 %v3167_v0  ;;  %2817 = vmatprep.mubr.msk.f32.mxu1 %vm3168_vm0, %v3167_v0 }
 0x3e7   : > { %2799 = vmatpush3.msra.mxu0 %v2165_v20 }
 0x3e8   : > { %2800 = vmatprep.subr.mxu0 %v3167_v0 }
 0x3e9   : > { %2801 = vmatpush3.msra.mxu0 %v2164_v43  ;;  %v2363_v43 = vld [vmem:[%s3767_s12 + $0x8] sm:$0xff] }
 0x3ea   : > { %2802 = vmatprep.subr.mxu0 %v3167_v0 }
 0x3eb   : > { %2803 = vmatpush3.msra.mxu0 %v2163_v44  ;;  %v2362_v44 = vld [vmem:[%s3767_s12] sm:$0xff] }
 0x3ec   : > { %2804 = vmatprep.subr.mxu0 %v3167_v0 }
 0x3ed   : > { %2805 = vmatpush3.msra.mxu0 %v2162_v53 }
 0x3ee   : > { %2820 = vmatprep.subr.mxu0 %v3167_v0 }
 0x4a0   : > { %v1786_v21 = vpop.f32.mrf.mxu0  ;;  %v1859_v22 = vpop.f32.mrf.mxu1 }
 0x4a2   : > { %v2782_v23 = vpop.f32.mrf.mxu0  ;;  %v2787_v24 = vpop.f32.mrf.mxu1 }
 0x4a3   : > { %v2280_v23 = vld [vmem:[#allocation8 + $0x18] sm:$0xff]  ;;  %v2279_v24 = vld [vmem:[#allocation8 + $0x10] sm:$0xff] }
 0x4a4   : > { %v1932_v25 = vpop.f32.mrf.mxu0  ;;  %v2005_v26 = vpop.f32.mrf.mxu1  ;;  %2810 = vmatpush3.msra.mxu1 %v2280_v23 }
 0x4a5   : > { %v2009_v27 = vcombine.low %v1786_v21, %v1932_v25  ;;  %v2010_v28 = vcombine.high %v1786_v21, %v1932_v25  ;;  %v2025_v29 = vcombine.low %v1859_v22, %v2005_v26  ;;  %v2026_v30 = vcombine.high %v1859_v22, %v2005_v26  ;;  %2811 = vmatprep.subr.mxu1 %v3167_v0  ;;  %v2278_v25 = vld [vmem:[#allocation8 + $0x8] sm:$0xff]  ;;  %v2369_v26 = vld [vmem:[%s3767_s12 + $0x38] sm:$0xff] }
 0x4a6   : > { %v2792_v31 = vpop.f32.mrf.mxu0  ;;  %v2797_v32 = vpop.f32.mrf.mxu1  ;;  %2812 = vmatpush3.msra.mxu1 %v2279_v24 }
 0x4a7   : > { %v2017_v33 = vrot.slane %v2009_v27, %v3516_v34  ;;  %v2024_v35 = vrot.slane %v2010_v28, %v3516_v34  ;;  %v2033_v36 = vrot.slane %v2025_v29, %v3516_v34  ;;  %v2040_v37 = vrot.slane %v2026_v30, %v3516_v34  ;;  %2813 = vmatprep.subr.mxu1 %v3167_v0  ;;  %v2368_v27 = vld [vmem:[%s3767_s12 + $0x30] sm:$0xff]  ;;  %v2367_v28 = vld [vmem:[%s3767_s12 + $0x28] sm:$0xff]  ;;  %v2366_v29 = vld [vmem:[%s3767_s12 + $0x20] sm:$0xff] }
 0x4a8   : > { %2814 = vmatpush3.msra.mxu1 %v2278_v25  ;;  %v2365_v30 = vld [vmem:[%s3767_s12 + $0x18] sm:$0xff] }
 0x4a9   : > { %v2041_v38 = vcombine.low %v2017_v33, %v2033_v36  ;;  %v2042_v39 = vcombine.high %v2017_v33, %v2033_v36  ;;  %v2057_v40 = vcombine.low %v2024_v35, %v2040_v37  ;;  %v2058_v42 = vcombine.high %v2024_v35, %v2040_v37  ;;  %2815 = vmatprep.subr.mxu1 %v3167_v0  ;;  %v2663_v36 = vld [vmem:[%s3769_s14] ss:$0 sm:$0xff] }
 0x4ab   : > { %v2049_v45 = vrot.slane %v2041_v38, %v3518_v41  ;;  %v2056_v46 = vrot.slane %v2042_v39, %v3518_v41  ;;  %v2065_v47 = vrot.slane %v2057_v40, %v3518_v41  ;;  %v2072_v48 = vrot.slane %v2058_v42, %v3518_v41  ;;  %v2664_v38 = vld [vmem:[%s3770_s15] ss:$0 sm:$0xff]  ;;  %v2364_v42 = vld [vmem:[%s3767_s12 + $0x10] sm:$0xff] }
 0x4ad   : > { %v2077_v49 = vcombine.low %v2049_v45, %v2056_v46  ;;  %v2659_v50 = vcombine.high %v2049_v45, %v2056_v46  ;;  %v2093_v51 = vcombine.low %v2065_v47, %v2072_v48  ;;  %v2660_v52 = vcombine.high %v2065_v47, %v2072_v48  ;;  %v2665_v45 = vld [vmem:[%s3817_s22] ss:$0 sm:$0xff] }
 0x4af   : > { %v2084_v54 = vrot.slane %v2077_v49, %v3516_v34  ;;  %v2092_v55 = vrot.slane %v2659_v50, %v3516_v34  ;;  %v2100_v56 = vrot.slane %v2093_v51, %v3516_v34  ;;  %v2108_v57 = vrot.slane %v2660_v52, %v3516_v34 }
 0x4b1   : > { %v2110_v58 = vcombine.high %v2084_v54, %v2092_v55  ;;  %v2126_v59 = vcombine.high %v2100_v56, %v2108_v57  ;;  %v2109_v60 = vcombine.low %v2084_v54, %v2092_v55  ;;  %v2125_v61 = vcombine.low %v2100_v56, %v2108_v57 }
 0x4b3   : > { %v2124_v62 = vrot.slane %v2110_v58, %v3518_v41  ;;  %v2140_v63 = vrot.slane %v2126_v59, %v3518_v41  ;;  %v2117_v1 = vrot.slane %v2109_v60, %v3518_v41  ;;  %v2133_v2 = vrot.slane %v2125_v61, %v3518_v41  ;;  %v2661_v41 = vld [vmem:[%s3764_s9] ss:$0 sm:$0xff] }
 0x4b5   : > { %v2143_v3 = vcombine.low %v2124_v62, %v2140_v63  ;;  %v2142_v4 = vcombine.high %v2117_v1, %v2133_v2  ;;  %v2141_v6 = vcombine.low %v2117_v1, %v2133_v2  ;;  %v2144_v34 = vcombine.high %v2124_v62, %v2140_v63  ;;  %v2669_v1 = vld [vmem:[%s3821_s8] ss:$0 sm:$0xff]  ;;  %s3071_s8 = sshll.u32 %s3177_s26, 4  ;;  %s3072_s8 = int_to_ptr.vmem [resolvable:$false] %s3071_s8 }
 0x4b6   : > { %s3073_s13 = scalar_lea.vmem %s3072_s8, 256  ;;  %p3074_p13 = scmp.lt.s32.totalorder %s2498_s21, %s3072_s8 }
 0x4b7   : > { %2150 = vrot.lane.b32.xlu0 %v2143_v3, %s3174_s1  ;;  %2146 = vrot.lane.b32.xlu1 %v2142_v4, %s3175_s2  ;;  %s3818_s1 = sld [smem:[#allocation29_spill]]  ;;  %v2670_v3 = vld [vmem:[%s3822_s11] ss:$0 sm:$0xff]  ;;  %p3075_p5 = scmp.lt.s32.totalorder %s3073_s13, %s3067_s24 }
 0x4b8   : > { %s3819_s2 = sld [smem:[#allocation17_spill]] }
 0x4b9   : > { %p3076_p10 = por %p3075_p5, %p3074_p13 }
 0x4bb   : > { %2154 = vrot.lane.b32.xlu1 %v2144_v34, %s3176_s20  ;;  %p3077_p1 = pnand %p3076_p10, %p3070_p7 }
 0x4bd   : > { %v2667_v50 = vld [vmem:[%s3818_s1] ss:$0 sm:$0xff] }
 0x4be   : > { %s2672_s18 = sshll.u32 %s3819_s2, 7 }
 0x4bf   : > { %s2495_s1 = scalar_lea.hbm %s3823_s25, %s2672_s18 }
 0x529   : > { %v2147_v7 = vpop.permute.xlu1 %2146  ;;  %v2151_v8 = vpop.permute.xlu0 %2150 }
 0x52a   : > { %v2157_v9 = vsel %vm1364_vm2, %v2141_v6, %v2147_v7 }
 0x52b   : > { %v2159_v11 = vsel %vm2158_vm3, %v2157_v9, %v2151_v8 }
 0x52d   : > { %v2155_v10 = vpop.permute.xlu1 %2154 }
 0x52e   : > { %v2161_v12 = vsel %vm2160_vm4, %v2159_v11, %v2155_v10 }
 0x52f   : > { %2807 = vmatmul.mubr.msk.f32.vlgmr.msra.gmra.mxu0 %vm687_vm1, %v2161_v12 }
 0x530   : > { %2836 = vmatprep.mubr.msk.f32.mxu0 %vm3168_vm0, %v3167_v0  ;;  %2821 = vmatpush3.msra.mxu0 %v2369_v26 }
 0x531   : > { %2822 = vmatprep.subr.mxu0 %v3167_v0 }
 0x532   : > { %2823 = vmatpush3.msra.mxu0 %v2368_v27 }
 0x533   : > { %2824 = vmatprep.subr.mxu0 %v3167_v0 }
 0x534   : > { %2825 = vmatpush3.msra.mxu0 %v2367_v28 }
 0x535   : > { %2826 = vmatprep.subr.mxu0 %v3167_v0 }
 0x536   : > { %2827 = vmatpush3.msra.mxu0 %v2366_v29 }
 0x537   : > { %2828 = vmatprep.subr.mxu0 %v3167_v0 }
 0x538   : > { %2829 = vmatpush3.msra.mxu0 %v2365_v30 }
 0x539   : > { %2830 = vmatprep.subr.mxu0 %v3167_v0 }
 0x53a   : > { %2831 = vmatpush3.msra.mxu0 %v2364_v42 }
 0x53b   : > { %2832 = vmatprep.subr.mxu0 %v3167_v0 }
 0x53c   : > { %2833 = vmatpush3.msra.mxu0 %v2363_v43 }
 0x53d   : > { %2834 = vmatprep.subr.mxu0 %v3167_v0 }
 0x53e   : > { %2835 = vmatpush3.msra.mxu0 %v2362_v44 }
 0x5ef   : > { %v2242_v13 = vpop.f32.mrf.mxu0 }
 0x5f0   : > { %v2243_v14 = vadd.f32 %v2661_v41, %v2242_v13 }
 0x5f1   : > { %v2808_v15 = vpop.f32.mrf.mxu0 }
 0x5f2   : > { %v2246_v16 = vadd.f32 %v2243_v14, %v3451_v5  ;;  %v2277_v5 = vld [vmem:[#allocation8] sm:$0xff] }
 0x5f3   : > { %2816 = vmatpush3.msra.mxu1 %v2277_v5 }
 0x5f4   : > { %v2247_v17 = vsel %vm687_vm1, %v2246_v16, 0.0 }
 0x5f5   : > { %2248 = vadd.xlane.f32.xlu0 %v2247_v17 }
 0x67e   : > { %v2249_v18 = vpop.xlane.xlu0 %2248 }
 0x67f   : > { %v2251_v19 = vmul.f32 0.03125, %v2249_v18 }
 0x681   : > { %v2252_v20 = vsub.f32 %v2246_v16, %v2251_v19 }
 0x683   : > { %v2253_v21 = vmul.f32 %v2252_v20, %v2252_v20 }
 0x685   : > { %v2254_v22 = vsel %vm687_vm1, %v2253_v21, 0.0 }
 0x686   : > { %2255 = vadd.xlane.f32.xlu1 %v2254_v22 }
 0x70f   : > { %v2256_v31 = vpop.xlane.xlu1 %2255 }
 0x710   : > { %v2257_v32 = vmul.f32 0.03125, %v2256_v31 }
 0x712   : > { %v2258_v33 = vadd.f32 1e-05, %v2257_v32 }
 0x714   : > { %2955 = vrsqrt.f32 %v2258_v33 }
 0x721   : > { %v2956_v35 = vpop.eup %2955 }
 0x722   : > { %v2260_v37 = vmul.f32 %v2956_v35, %v2252_v20 }
 0x724   : > { %v2268_v39 = vmul.f32 %v2663_v36, %v2260_v37 }
 0x726   : > { %v2276_v40 = vadd.f32 %v2664_v38, %v2268_v39 }
 0x728   : > { %2818 = vmatmul.mubr.msk.f32.vlgmr.msra.gmra.mxu1 %vm687_vm1, %v2276_v40 }
 0x7e8   : > { %v2357_v46 = vpop.f32.mrf.mxu1 }
 0x7e9   : > { %v2358_v47 = vadd.f32 %v2665_v45, %v2357_v46 }
 0x7ea   : > { %v2819_v48 = vpop.f32.mrf.mxu1 }
 0x7eb   : > { %v2361_v49 = vmax.f32 %v2358_v47, 0.0 }
 0x7ed   : > { %2837 = vmatmul.mubr.msk.f32.vlgmr.msra.gmra.mxu0 %vm2377_vm5, %v2361_v49 }
 0x8ad   : > { %v2447_v51 = vpop.f32.mrf.mxu0 }
 0x8ae   : > { %v2448_v52 = vadd.f32 %v2667_v50, %v2447_v51 }
 0x8af   : > { %v2838_v53 = vpop.f32.mrf.mxu0 }
 0x8b0   : > { %v2451_v54 = vadd.f32 %v2448_v52, %v2276_v40 }
 0x8b2   : > { %v2452_v0 = vsel %vm687_vm1, %v2451_v54, 0.0 }
 0x8b3   : > { %2453 = vadd.xlane.f32.xlu0 %v2452_v0 }
 0x93c   : > { %v2454_v55 = vpop.xlane.xlu0 %2453 }
 0x93d   : > { %v2455_v56 = vmul.f32 0.03125, %v2454_v55 }
 0x93f   : > { %v2456_v57 = vsub.f32 %v2451_v54, %v2455_v56 }
 0x941   : > { %v2457_v58 = vmul.f32 %v2456_v57, %v2456_v57 }
 0x943   : > { %v2458_v59 = vsel %vm687_vm1, %v2457_v58, 0.0 }
 0x944   : > { %2459 = vadd.xlane.f32.xlu0 %v2458_v59 }
 0x9cd   : > { %v2460_v60 = vpop.xlane.xlu0 %2459 }
 0x9ce   : > { %v2461_v61 = vmul.f32 0.03125, %v2460_v60 }
 0x9d0   : > { %v2462_v62 = vadd.f32 1e-05, %v2461_v61 }
 0x9d2   : > { %2957 = vrsqrt.f32 %v2462_v62 }
 0x9df   : > { %v2958_v63 = vpop.eup %2957 }
 0x9e0   : > { %v2464_v2 = vmul.f32 %v2958_v63, %v2456_v57 }
 0x9e2   : > { %v2472_v4 = vmul.f32 %v2669_v1, %v2464_v2 }
 0x9e4   : > { %v2480_v6 = vadd.f32 %v2670_v3, %v2472_v4 }
 0x9e6   : > { %2481 = vst.msk [vmem:[%s673_s0] sm:$0xff] %vm687_vm1, %v2480_v6 }
 0x9e7   : > { %3080 = shalt.err (!%p3077_p1)
}
 0x9e8   : > { %s3081_s2 = scalar_lea.hbm %s2495_s1, 128  ;;  %s3085_s27 = scalar_lea.hbm %s3823_s25, 256 }
 0x9e9   : > { %p3082_p2 = scmp.ne.s32.totalorder %s2495_s1, %s3081_s2  ;;  %p3086_p11 = scmp.lt.s32.totalorder %s2495_s1, %s3823_s25 }
 0x9ea   : > { %p3087_p0 = scmp.lt.s32.totalorder %s3085_s27, %s3081_s2 }
 0x9eb   : > { %p3083_p6 = pnand %p3082_p2, %p3364_p9 }
 0x9ec   : > { %p3088_p12 = por %p3087_p0, %p3086_p11 }
 0x9ed   : > { %p3084_p8 = pneg %p3083_p6 }
 0x9ef   : > { %p3089_p4 = pnand %p3088_p12, %p3084_p8 }
 0x9f1   : > { %3092 = shalt.err (!%p3089_p4)
}
 0x9f2   : > { %2851 = dma.vmem_to_hbm [thread:$0]  (%p3364_p9), %s2498_s21, 128, %s2495_s1, %s2483_s3  }
 0x9f3 PF: > { %s3824_s0 = sld [smem:[#allocation16_spill]]  ;;  %p3827_p7 = scmp.ge.s32.totalorder %s3159_s19, 2 }
 0x9f4   : > { %s3825_s22 = sld [smem:[#allocation19_spill]] }
 0x9f9   : > { %s2509_s16 = sand.u32 1, %s3824_s0  }
 0x9fa   : > { %p3826_p3 = scmp.ne.s32.totalorder %s3825_s22, 0  ;;  %s2510_s24 = scalar_lea.sflag [#allocation4], %s2509_s16 }
 0x9fc   : > { %p2868_p13 = pnand %p3827_p7, %p3826_p3 }
 0x9fe   : > { %p2869_p5 = pneg %p2868_p13 }
 0xa00   : > { %3134 = dma.done.wait (%p2869_p5), %s2510_s24, 128  }
 0xa01   : > { %3136 = vsyncadd (%p2869_p5), %s2510_s24, 4294967168  ;;  %s38_s19 = sadd.s32 1, %s3159_s19   ;;  %s3828_s30 = sld [smem:[#allocation18_spill]] }
 0xa02   : > { %p35_p10 = scmp.ge.s32.totalorder %s38_s19, 4   ;;  %s3829_s0 = sld [smem:[#allocation20_spill]] }
 0xa03   : > { %s3830_s27 = smov %s3143_s28  ;;  %s3831_s28 = smov %s3147_s29 }
 0xa04   : > { %s3832_s29 = smov %s3373_s23  ;;  %37 = sbr.rel (!%p35_p10) target bundleno = 21 (0x15), region = 158 }
 0xa09   :  { %2515 = vsyncpa [#allocation3], 1 }
 0xa0a   :  { %2517 = vsyncpa [#allocation3 + $0x1], 1 }
 0xa0b   :  { %2518 = vsyncpa [#allocation6], 1 }
 0xa0c   :  { %2520 = vsyncpa [#allocation6 + $0x1], 1 }
 0xa0d   :  { %2521 = vsyncpa [#allocation9], 1 }
 0xa0e   :  { %2522 = vsyncpa [#allocation4], 1 }
 0xa0f   :  { %2524 = vsyncpa [#allocation4 + $0x1], 1 }

</bundles_post_ra>
